<compile_context>
chip_gen: v6e
topology: v6e:2x2x1
jax: 0.10.0
libtpu: 0.0.40
codegen_flags: <defaults>
</compile_context>

<pallas_src>
import functools

import jax
import jax.numpy as jnp
from jax import lax
from jax.experimental import pallas as pl
from jax.experimental.pallas import tpu as pltpu


def _make_layer_kernel(BS, H, T, tau=2.0, v_th=1.0, eps=1e-5):
    H4 = 4 * H
    inv_tau = 1.0 / tau          # reciprocal multiply instead of divide
    inv_T = 1.0 / float(T)

    def bn_onepass(v2d, gamma, beta, n_rows):
        # Training-mode BatchNorm1d over channel = last axis, statistics over
        # all rows (biased variance), eps = 1e-5.  Single traversal for
        # sum & sum-of-squares; clamp var>=0 against cancellation.
        # TODO(synk): E[x^2]-mean^2 cancels when |mean| >> std; the future
        # tiled version should use a shifted / two-pass variance.
        inv_n = 1.0 / float(n_rows)
        s = jnp.sum(v2d, axis=0, keepdims=True)
        sq = jnp.sum(v2d * v2d, axis=0, keepdims=True)
        mean = s * inv_n
        var = jnp.maximum(sq * inv_n - mean * mean, 0.0)
        return (v2d - mean) * (lax.rsqrt(var + eps) * gamma) + beta

    def kernel(xin_ref,                   # x + irfft-filtered x (BS, H) f32
               fg_ref, fb_ref,            # FilterLayer BN gamma/beta   (1, H)
               w1_ref,                    # dense_1 weight (H, 4H) bf16; bias absorbed by bn_1
               g1_ref, be1_ref,           # bn_1 gamma/beta             (1, 4H)
               w2_ref,                    # dense_2 weight (4H, H) bf16; bias absorbed by bn_2
               g2_ref, be2_ref,           # bn_2 gamma/beta             (1, H)
               g3_ref, be3_ref,           # last_bn gamma/beta          (1, H)
               out_ref,
               spk_ref,                   # (T*BS, 4H) bf16 scratch: all spike maps
               zb_ref):                   # (T*BS, H)  f32  scratch: bn_2 output

        # ---- FilterLayer tail: dropout(identity) + residual(pre-added) + BN ----
        h = bn_onepass(xin_ref[...], fg_ref[...], fb_ref[...], BS)   # (BS, H) f32

        # ---- Intermediate ----
        # dense_1 (bf16-in, f32-acc; +b1 dropped: absorbed by bn_1) + bn_1
        a = jnp.dot(h.astype(jnp.bfloat16), w1_ref[...],
                    preferred_element_type=jnp.float32)
        a = bn_onepass(a, g1_ref[...], be1_ref[...], BS)             # (BS, 4H)

        # intermediate_act_lif: multi-step LIF over T with constant input `a`.
        # Each step's spike map goes straight into the bf16 scratch slab
        # (tile-aligned rows), so the only live vreg state is the membrane `v`.
        def lif1_body(t, v):
            v = v + (a - v) * inv_tau                     # charge (decay_input, v_reset=0)
            fired = v >= v_th                             # fire
            row0 = pl.multiple_of(t * BS, BS)
            spk_ref[pl.ds(row0, BS), :] = fired.astype(jnp.bfloat16)  # 0/1 exact
            return jnp.where(fired, 0.0, v)               # hard reset to 0

        lax.fori_loop(0, T, lif1_body, jnp.zeros((BS, H4), jnp.float32),
                      unroll=True)

        # dense_2 for all T time steps in ONE bf16 MXU matmul (f32 acc);
        # +b2 dropped (absorbed by bn_2).
        z = jnp.dot(spk_ref[...], w2_ref[...],
                    preferred_element_type=jnp.float32)   # (T*BS, H) f32
        # residual: broadcast-add h over the T axis (no T-times copy of h).
        z = (z.reshape(T, BS, H) + h).reshape(T * BS, H)

        # bn_2: stats over all T*B*S rows per channel, one pass over the slab.
        zb_ref[...] = bn_onepass(z, g2_ref[...], be2_ref[...], T * BS)

        # last_lif: multi-step LIF over T, then mean over T (carried accums only).
        def lif2_body(t, carry):
            v2, acc = carry
            row0 = pl.multiple_of(t * BS, BS)
            zt = zb_ref[pl.ds(row0, BS), :]               # (BS, H) f32
            v2 = v2 + (zt - v2) * inv_tau
            fired = v2 >= v_th
            acc = acc + fired.astype(jnp.float32)
            return jnp.where(fired, 0.0, v2), acc

        _, acc = lax.fori_loop(
            0, T, lif2_body,
            (jnp.zeros((BS, H), jnp.float32), jnp.zeros((BS, H), jnp.float32)),
            unroll=True)
        m = acc * inv_T                                   # (BS, H)

        # last_bn
        out_ref[...] = bn_onepass(m, g3_ref[...], be3_ref[...], BS)

    return kernel


def init_params(key, S, H):
    F = S // 2 + 1
    k = jax.random.split(key, 5)
    return dict(
        complex_weight=0.02 * jax.random.normal(k[0], (1, F, H, 2), jnp.float32),
        w1=0.05 * jax.random.normal(k[1], (H, 4 * H), jnp.float32),
        # b1 / b2 are kept for interface parity but are mathematically no-ops:
        # the immediately-following BatchNorms subtract the per-channel mean.
        b1=0.05 * jax.random.normal(k[2], (1, 4 * H), jnp.float32),
        w2=0.05 * jax.random.normal(k[3], (4 * H, H), jnp.float32),
        b2=0.05 * jax.random.normal(k[4], (1, H), jnp.float32),
        # BatchNorm affine params (PyTorch default init: gamma=1, beta=0)
        f_gamma=jnp.ones((1, H), jnp.float32), f_beta=jnp.zeros((1, H), jnp.float32),
        g1=jnp.ones((1, 4 * H), jnp.float32), be1=jnp.zeros((1, 4 * H), jnp.float32),
        g2=jnp.ones((1, H), jnp.float32), be2=jnp.zeros((1, H), jnp.float32),
        g3=jnp.ones((1, H), jnp.float32), be3=jnp.zeros((1, H), jnp.float32),
    )


@functools.partial(jax.jit, static_argnames=("T",))
def ssr_layer_forward(x, params, T=4):
    B, S, H = x.shape
    BS = B * S

    # --- FilterLayer spectral filter (glue: FFT / complex not expressible in
    #     Pallas TPU; everything downstream runs in the kernel). ---
    # TODO(synk): rfft/irfft have no Pallas equivalent; computed in plain JAX.
    w_c = params["complex_weight"][..., 0] + 1j * params["complex_weight"][..., 1]
    xf = jnp.fft.rfft(x.astype(jnp.float32), axis=1, norm="ortho")
    y_fft = jnp.fft.irfft(xf * w_c, n=S, axis=1, norm="ortho").astype(jnp.float32)
    # Residual add fused into the FFT epilogue by XLA; the kernel then needs a
    # single (BS, H) activation input (halves activation DMA into the kernel).
    xin = (x.astype(jnp.float32) + y_fft).reshape(BS, H)

    kernel = _make_layer_kernel(BS, H, T)

    operands = (
        xin,
        params["f_gamma"], params["f_beta"],
        params["w1"].astype(jnp.bfloat16),     # bf16 MXU operand (f32 acc)
        params["g1"], params["be1"],
        params["w2"].astype(jnp.bfloat16),     # bf16 MXU operand (spikes are exact 0/1)
        params["g2"], params["be2"],
        params["g3"], params["be3"],
    )

    vmem = pl.BlockSpec(memory_space=pltpu.MemorySpace.VMEM)
    out2d = pl.pallas_call(
        kernel,
        out_shape=jax.ShapeDtypeStruct((BS, H), jnp.float32),
        in_specs=[vmem] * len(operands),
        out_specs=vmem,
        scratch_shapes=[
            pltpu.VMEM((T * BS, 4 * H), jnp.bfloat16),   # spike slab for dense_2
            pltpu.VMEM((T * BS, H), jnp.float32),        # bn_2 output slab
        ],
    )(*operands)
    return out2d.reshape(B, S, H)


if __name__ == "__main__":
    # hidden_size chosen as a multiple of 128 so every slab and the output are
    # lane-dense (full vregs, unmasked stores) and the bf16 spike rows per step
    # (BS = 16) are (16,128)-tile aligned; batch=2, max_seq_length=8, T=4.
    B, S, H, T = 2, 8, 128, 4
    key = jax.random.PRNGKey(0)
    k_x, k_p = jax.random.split(key)
    x = jax.random.normal(k_x, (B, S, H), dtype=jnp.float32)
    params = init_params(k_p, S, H)

    out = ssr_layer_forward(x, params, T=T)
    out = jax.block_until_ready(out)
    assert out.shape == (B, S, H) and out.dtype == jnp.float32
    assert bool(jnp.all(jnp.isfinite(out)))
    print("KERNEL_OK")
</pallas_src>

<mosaic_0001>
module attributes {stable_mosaic.version = 11 : i64} {
  func.func @kernel(%arg0: memref<16x128xf32, #tpu.memory_space<vmem>>, %arg1: memref<1x128xf32, #tpu.memory_space<vmem>>, %arg2: memref<1x128xf32, #tpu.memory_space<vmem>>, %arg3: memref<128x512xbf16, #tpu.memory_space<vmem>>, %arg4: memref<1x512xf32, #tpu.memory_space<vmem>>, %arg5: memref<1x512xf32, #tpu.memory_space<vmem>>, %arg6: memref<512x128xbf16, #tpu.memory_space<vmem>>, %arg7: memref<1x128xf32, #tpu.memory_space<vmem>>, %arg8: memref<1x128xf32, #tpu.memory_space<vmem>>, %arg9: memref<1x128xf32, #tpu.memory_space<vmem>>, %arg10: memref<1x128xf32, #tpu.memory_space<vmem>>, %arg11: memref<16x128xf32, #tpu.memory_space<vmem>>, %arg12: memref<64x512xbf16, #tpu.memory_space<vmem>>, %arg13: memref<64x128xf32, #tpu.memory_space<vmem>>) attributes {dimension_semantics = [], scalar_prefetch = 0 : i64, scratch_operands = 2 : i64, tpu.core_type = #tpu.core_type<tc>} {
    %c0 = arith.constant 0 : index
    %c0_0 = arith.constant 0 : index
    %0 = vector.load %arg0[%c0, %c0_0] : memref<16x128xf32, #tpu.memory_space<vmem>>, vector<16x128xf32>
    %c0_1 = arith.constant 0 : index
    %c0_2 = arith.constant 0 : index
    %1 = vector.load %arg1[%c0_1, %c0_2] : memref<1x128xf32, #tpu.memory_space<vmem>>, vector<1x128xf32>
    %c0_3 = arith.constant 0 : index
    %c0_4 = arith.constant 0 : index
    %2 = vector.load %arg2[%c0_3, %c0_4] : memref<1x128xf32, #tpu.memory_space<vmem>>, vector<1x128xf32>
    %cst = arith.constant dense<0.000000e+00> : vector<128xf32>
    %3 = vector.multi_reduction <add>, %0, %cst [0] : vector<16x128xf32> to vector<128xf32>
    %4 = vector.shape_cast %3 : vector<128xf32> to vector<1x128xf32>
    %5 = arith.mulf %0, %0 : vector<16x128xf32>
    %cst_5 = arith.constant dense<0.000000e+00> : vector<128xf32>
    %6 = vector.multi_reduction <add>, %5, %cst_5 [0] : vector<16x128xf32> to vector<128xf32>
    %7 = vector.shape_cast %6 : vector<128xf32> to vector<1x128xf32>
    %cst_6 = arith.constant 6.250000e-02 : f32
    %8 = vector.broadcast %cst_6 : f32 to vector<1x128xf32>
    %9 = arith.mulf %4, %8 : vector<1x128xf32>
    %cst_7 = arith.constant 6.250000e-02 : f32
    %10 = vector.broadcast %cst_7 : f32 to vector<1x128xf32>
    %11 = arith.mulf %7, %10 : vector<1x128xf32>
    %12 = arith.mulf %9, %9 : vector<1x128xf32>
    %13 = arith.subf %11, %12 : vector<1x128xf32>
    %cst_8 = arith.constant 0.000000e+00 : f32
    %14 = vector.broadcast %cst_8 : f32 to vector<1x128xf32>
    %15 = arith.maximumf %13, %14 : vector<1x128xf32>
    %16 = vector.broadcast %9 : vector<1x128xf32> to vector<16x128xf32>
    %17 = arith.subf %0, %16 : vector<16x128xf32>
    %cst_9 = arith.constant 9.99999974E-6 : f32
    %18 = vector.broadcast %cst_9 : f32 to vector<1x128xf32>
    %19 = arith.addf %15, %18 : vector<1x128xf32>
    %20 = math.rsqrt %19 : vector<1x128xf32>
    %21 = arith.mulf %20, %1 : vector<1x128xf32>
    %22 = vector.broadcast %21 : vector<1x128xf32> to vector<16x128xf32>
    %23 = arith.mulf %17, %22 : vector<16x128xf32>
    %24 = vector.broadcast %2 : vector<1x128xf32> to vector<16x128xf32>
    %25 = arith.addf %23, %24 : vector<16x128xf32>
    %26 = arith.truncf %25 : vector<16x128xf32> to vector<16x128xbf16>
    %c0_10 = arith.constant 0 : index
    %c0_11 = arith.constant 0 : index
    %27 = vector.load %arg3[%c0_10, %c0_11] : memref<128x512xbf16, #tpu.memory_space<vmem>>, vector<128x512xbf16>
    %cst_12 = arith.constant dense<0.000000e+00> : vector<16x512xf32>
    %28 = tpu.matmul %26, %27, %cst_12 {dimension_numbers = #tpu.dot_dimension_numbers<[1], [0], [0], [1], [0, 0, 1, 1], [], []>} : vector<16x128xbf16>, vector<128x512xbf16>, vector<16x512xf32> -> vector<16x512xf32>
    %c0_13 = arith.constant 0 : index
    %c0_14 = arith.constant 0 : index
    %29 = vector.load %arg4[%c0_13, %c0_14] : memref<1x512xf32, #tpu.memory_space<vmem>>, vector<1x512xf32>
    %c0_15 = arith.constant 0 : index
    %c0_16 = arith.constant 0 : index
    %30 = vector.load %arg5[%c0_15, %c0_16] : memref<1x512xf32, #tpu.memory_space<vmem>>, vector<1x512xf32>
    %cst_17 = arith.constant dense<0.000000e+00> : vector<512xf32>
    %31 = vector.multi_reduction <add>, %28, %cst_17 [0] : vector<16x512xf32> to vector<512xf32>
    %32 = vector.shape_cast %31 : vector<512xf32> to vector<1x512xf32>
    %33 = arith.mulf %28, %28 : vector<16x512xf32>
    %cst_18 = arith.constant dense<0.000000e+00> : vector<512xf32>
    %34 = vector.multi_reduction <add>, %33, %cst_18 [0] : vector<16x512xf32> to vector<512xf32>
    %35 = vector.shape_cast %34 : vector<512xf32> to vector<1x512xf32>
    %cst_19 = arith.constant 6.250000e-02 : f32
    %36 = vector.broadcast %cst_19 : f32 to vector<1x512xf32>
    %37 = arith.mulf %32, %36 : vector<1x512xf32>
    %cst_20 = arith.constant 6.250000e-02 : f32
    %38 = vector.broadcast %cst_20 : f32 to vector<1x512xf32>
    %39 = arith.mulf %35, %38 : vector<1x512xf32>
    %40 = arith.mulf %37, %37 : vector<1x512xf32>
    %41 = arith.subf %39, %40 : vector<1x512xf32>
    %cst_21 = arith.constant 0.000000e+00 : f32
    %42 = vector.broadcast %cst_21 : f32 to vector<1x512xf32>
    %43 = arith.maximumf %41, %42 : vector<1x512xf32>
    %44 = vector.broadcast %37 : vector<1x512xf32> to vector<16x512xf32>
    %45 = arith.subf %28, %44 : vector<16x512xf32>
    %cst_22 = arith.constant 9.99999974E-6 : f32
    %46 = vector.broadcast %cst_22 : f32 to vector<1x512xf32>
    %47 = arith.addf %43, %46 : vector<1x512xf32>
    %48 = math.rsqrt %47 : vector<1x512xf32>
    %49 = arith.mulf %48, %29 : vector<1x512xf32>
    %50 = vector.broadcast %49 : vector<1x512xf32> to vector<16x512xf32>
    %51 = arith.mulf %45, %50 : vector<16x512xf32>
    %52 = vector.broadcast %30 : vector<1x512xf32> to vector<16x512xf32>
    %53 = arith.addf %51, %52 : vector<16x512xf32>
    %cst_23 = arith.constant 0.000000e+00 : f32
    %54 = vector.broadcast %cst_23 : f32 to vector<16x512xf32>
    %c0_i32 = arith.constant 0 : i32
    %55 = arith.subf %53, %54 : vector<16x512xf32>
    %cst_24 = arith.constant 5.000000e-01 : f32
    %56 = vector.broadcast %cst_24 : f32 to vector<16x512xf32>
    %57 = arith.mulf %55, %56 : vector<16x512xf32>
    %58 = arith.addf %54, %57 : vector<16x512xf32>
    %cst_25 = arith.constant 1.000000e+00 : f32
    %59 = vector.broadcast %cst_25 : f32 to vector<16x512xf32>
    %60 = arith.cmpf oge, %58, %59 : vector<16x512xf32>
    %c16_i32 = arith.constant 16 : i32
    %61 = arith.muli %c0_i32, %c16_i32 : i32
    %62 = tpu.assume_multiple %61, 16 : i32
    %63 = arith.extui %60 : vector<16x512xi1> to vector<16x512xi32>
    %64 = arith.sitofp %63 : vector<16x512xi32> to vector<16x512xf32>
    %65 = arith.truncf %64 : vector<16x512xf32> to vector<16x512xbf16>
    %66 = arith.index_cast %62 : i32 to index
    %c0_26 = arith.constant 0 : index
    %67 = vector.load %arg12[%66, %c0_26] : memref<64x512xbf16, #tpu.memory_space<vmem>>, vector<16x512xbf16>
    tpu.vector_store %arg12[%66, %c0_26], %65 {strides = array<i32>} : memref<64x512xbf16, #tpu.memory_space<vmem>>, vector<16x512xbf16>,
    %cst_27 = arith.constant 0.000000e+00 : f32
    %68 = vector.broadcast %cst_27 : f32 to vector<16x512xf32>
    %69 = arith.select %60, %68, %58 : vector<16x512xi1>, vector<16x512xf32>
    %c1_i32 = arith.constant 1 : i32
    %70 = arith.subf %53, %69 : vector<16x512xf32>
    %cst_28 = arith.constant 5.000000e-01 : f32
    %71 = vector.broadcast %cst_28 : f32 to vector<16x512xf32>
    %72 = arith.mulf %70, %71 : vector<16x512xf32>
    %73 = arith.addf %69, %72 : vector<16x512xf32>
    %cst_29 = arith.constant 1.000000e+00 : f32
    %74 = vector.broadcast %cst_29 : f32 to vector<16x512xf32>
    %75 = arith.cmpf oge, %73, %74 : vector<16x512xf32>
    %c16_i32_30 = arith.constant 16 : i32
    %76 = arith.muli %c1_i32, %c16_i32_30 : i32
    %77 = tpu.assume_multiple %76, 16 : i32
    %78 = arith.extui %75 : vector<16x512xi1> to vector<16x512xi32>
    %79 = arith.sitofp %78 : vector<16x512xi32> to vector<16x512xf32>
    %80 = arith.truncf %79 : vector<16x512xf32> to vector<16x512xbf16>
    %81 = arith.index_cast %77 : i32 to index
    %c0_31 = arith.constant 0 : index
    %82 = vector.load %arg12[%81, %c0_31] : memref<64x512xbf16, #tpu.memory_space<vmem>>, vector<16x512xbf16>
    tpu.vector_store %arg12[%81, %c0_31], %80 {strides = array<i32>} : memref<64x512xbf16, #tpu.memory_space<vmem>>, vector<16x512xbf16>,
    %cst_32 = arith.constant 0.000000e+00 : f32
    %83 = vector.broadcast %cst_32 : f32 to vector<16x512xf32>
    %84 = arith.select %75, %83, %73 : vector<16x512xi1>, vector<16x512xf32>
    %c2_i32 = arith.constant 2 : i32
    %85 = arith.subf %53, %84 : vector<16x512xf32>
    %cst_33 = arith.constant 5.000000e-01 : f32
    %86 = vector.broadcast %cst_33 : f32 to vector<16x512xf32>
    %87 = arith.mulf %85, %86 : vector<16x512xf32>
    %88 = arith.addf %84, %87 : vector<16x512xf32>
    %cst_34 = arith.constant 1.000000e+00 : f32
    %89 = vector.broadcast %cst_34 : f32 to vector<16x512xf32>
    %90 = arith.cmpf oge, %88, %89 : vector<16x512xf32>
    %c16_i32_35 = arith.constant 16 : i32
    %91 = arith.muli %c2_i32, %c16_i32_35 : i32
    %92 = tpu.assume_multiple %91, 16 : i32
    %93 = arith.extui %90 : vector<16x512xi1> to vector<16x512xi32>
    %94 = arith.sitofp %93 : vector<16x512xi32> to vector<16x512xf32>
    %95 = arith.truncf %94 : vector<16x512xf32> to vector<16x512xbf16>
    %96 = arith.index_cast %92 : i32 to index
    %c0_36 = arith.constant 0 : index
    %97 = vector.load %arg12[%96, %c0_36] : memref<64x512xbf16, #tpu.memory_space<vmem>>, vector<16x512xbf16>
    tpu.vector_store %arg12[%96, %c0_36], %95 {strides = array<i32>} : memref<64x512xbf16, #tpu.memory_space<vmem>>, vector<16x512xbf16>,
    %cst_37 = arith.constant 0.000000e+00 : f32
    %98 = vector.broadcast %cst_37 : f32 to vector<16x512xf32>
    %99 = arith.select %90, %98, %88 : vector<16x512xi1>, vector<16x512xf32>
    %c3_i32 = arith.constant 3 : i32
    %100 = arith.subf %53, %99 : vector<16x512xf32>
    %cst_38 = arith.constant 5.000000e-01 : f32
    %101 = vector.broadcast %cst_38 : f32 to vector<16x512xf32>
    %102 = arith.mulf %100, %101 : vector<16x512xf32>
    %103 = arith.addf %99, %102 : vector<16x512xf32>
    %cst_39 = arith.constant 1.000000e+00 : f32
    %104 = vector.broadcast %cst_39 : f32 to vector<16x512xf32>
    %105 = arith.cmpf oge, %103, %104 : vector<16x512xf32>
    %c16_i32_40 = arith.constant 16 : i32
    %106 = arith.muli %c3_i32, %c16_i32_40 : i32
    %107 = tpu.assume_multiple %106, 16 : i32
    %108 = arith.extui %105 : vector<16x512xi1> to vector<16x512xi32>
    %109 = arith.sitofp %108 : vector<16x512xi32> to vector<16x512xf32>
    %110 = arith.truncf %109 : vector<16x512xf32> to vector<16x512xbf16>
    %111 = arith.index_cast %107 : i32 to index
    %c0_41 = arith.constant 0 : index
    %112 = vector.load %arg12[%111, %c0_41] : memref<64x512xbf16, #tpu.memory_space<vmem>>, vector<16x512xbf16>
    tpu.vector_store %arg12[%111, %c0_41], %110 {strides = array<i32>} : memref<64x512xbf16, #tpu.memory_space<vmem>>, vector<16x512xbf16>,
    %cst_42 = arith.constant 0.000000e+00 : f32
    %113 = vector.broadcast %cst_42 : f32 to vector<16x512xf32>
    %114 = arith.select %105, %113, %103 : vector<16x512xi1>, vector<16x512xf32>
    %c4_i32 = arith.constant 4 : i32
    %c0_43 = arith.constant 0 : index
    %c0_44 = arith.constant 0 : index
    %115 = vector.load %arg12[%c0_43, %c0_44] : memref<64x512xbf16, #tpu.memory_space<vmem>>, vector<64x512xbf16>
    %c0_45 = arith.constant 0 : index
    %c0_46 = arith.constant 0 : index
    %116 = vector.load %arg6[%c0_45, %c0_46] : memref<512x128xbf16, #tpu.memory_space<vmem>>, vector<512x128xbf16>
    %cst_47 = arith.constant dense<0.000000e+00> : vector<64x128xf32>
    %117 = tpu.matmul %115, %116, %cst_47 {dimension_numbers = #tpu.dot_dimension_numbers<[1], [0], [0], [1], [0, 0, 1, 1], [], []>} : vector<64x512xbf16>, vector<512x128xbf16>, vector<64x128xf32> -> vector<64x128xf32>
    %118 = vector.shape_cast %117 : vector<64x128xf32> to vector<4x16x128xf32>
    %119 = vector.shape_cast %25 : vector<16x128xf32> to vector<1x16x128xf32>
    %120 = vector.broadcast %119 : vector<1x16x128xf32> to vector<4x16x128xf32>
    %121 = arith.addf %118, %120 : vector<4x16x128xf32>
    %122 = vector.shape_cast %121 : vector<4x16x128xf32> to vector<64x128xf32>
    %c0_48 = arith.constant 0 : index
    %c0_49 = arith.constant 0 : index
    %123 = vector.load %arg7[%c0_48, %c0_49] : memref<1x128xf32, #tpu.memory_space<vmem>>, vector<1x128xf32>
    %c0_50 = arith.constant 0 : index
    %c0_51 = arith.constant 0 : index
    %124 = vector.load %arg8[%c0_50, %c0_51] : memref<1x128xf32, #tpu.memory_space<vmem>>, vector<1x128xf32>
    %cst_52 = arith.constant dense<0.000000e+00> : vector<128xf32>
    %125 = vector.multi_reduction <add>, %122, %cst_52 [0] : vector<64x128xf32> to vector<128xf32>
    %126 = vector.shape_cast %125 : vector<128xf32> to vector<1x128xf32>
    %127 = arith.mulf %122, %122 : vector<64x128xf32>
    %cst_53 = arith.constant dense<0.000000e+00> : vector<128xf32>
    %128 = vector.multi_reduction <add>, %127, %cst_53 [0] : vector<64x128xf32> to vector<128xf32>
    %129 = vector.shape_cast %128 : vector<128xf32> to vector<1x128xf32>
    %cst_54 = arith.constant 1.562500e-02 : f32
    %130 = vector.broadcast %cst_54 : f32 to vector<1x128xf32>
    %131 = arith.mulf %126, %130 : vector<1x128xf32>
    %cst_55 = arith.constant 1.562500e-02 : f32
    %132 = vector.broadcast %cst_55 : f32 to vector<1x128xf32>
    %133 = arith.mulf %129, %132 : vector<1x128xf32>
    %134 = arith.mulf %131, %131 : vector<1x128xf32>
    %135 = arith.subf %133, %134 : vector<1x128xf32>
    %cst_56 = arith.constant 0.000000e+00 : f32
    %136 = vector.broadcast %cst_56 : f32 to vector<1x128xf32>
    %137 = arith.maximumf %135, %136 : vector<1x128xf32>
    %138 = vector.broadcast %131 : vector<1x128xf32> to vector<64x128xf32>
    %139 = arith.subf %122, %138 : vector<64x128xf32>
    %cst_57 = arith.constant 9.99999974E-6 : f32
    %140 = vector.broadcast %cst_57 : f32 to vector<1x128xf32>
    %141 = arith.addf %137, %140 : vector<1x128xf32>
    %142 = math.rsqrt %141 : vector<1x128xf32>
    %143 = arith.mulf %142, %123 : vector<1x128xf32>
    %144 = vector.broadcast %143 : vector<1x128xf32> to vector<64x128xf32>
    %145 = arith.mulf %139, %144 : vector<64x128xf32>
    %146 = vector.broadcast %124 : vector<1x128xf32> to vector<64x128xf32>
    %147 = arith.addf %145, %146 : vector<64x128xf32>
    %c0_58 = arith.constant 0 : index
    %c0_59 = arith.constant 0 : index
    %148 = vector.load %arg13[%c0_58, %c0_59] : memref<64x128xf32, #tpu.memory_space<vmem>>, vector<64x128xf32>
    tpu.vector_store %arg13[%c0_58, %c0_59], %147 {strides = array<i32>} : memref<64x128xf32, #tpu.memory_space<vmem>>, vector<64x128xf32>,
    %cst_60 = arith.constant 0.000000e+00 : f32
    %149 = vector.broadcast %cst_60 : f32 to vector<16x128xf32>
    %cst_61 = arith.constant 0.000000e+00 : f32
    %150 = vector.broadcast %cst_61 : f32 to vector<16x128xf32>
    %c0_i32_62 = arith.constant 0 : i32
    %c16_i32_63 = arith.constant 16 : i32
    %151 = arith.muli %c0_i32_62, %c16_i32_63 : i32
    %152 = tpu.assume_multiple %151, 16 : i32
    %153 = arith.index_cast %152 : i32 to index
    %c0_64 = arith.constant 0 : index
    %154 = vector.load %arg13[%153, %c0_64] : memref<64x128xf32, #tpu.memory_space<vmem>>, vector<16x128xf32>
    %155 = arith.subf %154, %149 : vector<16x128xf32>
    %cst_65 = arith.constant 5.000000e-01 : f32
    %156 = vector.broadcast %cst_65 : f32 to vector<16x128xf32>
    %157 = arith.mulf %155, %156 : vector<16x128xf32>
    %158 = arith.addf %149, %157 : vector<16x128xf32>
    %cst_66 = arith.constant 1.000000e+00 : f32
    %159 = vector.broadcast %cst_66 : f32 to vector<16x128xf32>
    %160 = arith.cmpf oge, %158, %159 : vector<16x128xf32>
    %161 = arith.extui %160 : vector<16x128xi1> to vector<16x128xi32>
    %162 = arith.sitofp %161 : vector<16x128xi32> to vector<16x128xf32>
    %163 = arith.addf %150, %162 : vector<16x128xf32>
    %cst_67 = arith.constant 0.000000e+00 : f32
    %164 = vector.broadcast %cst_67 : f32 to vector<16x128xf32>
    %165 = arith.select %160, %164, %158 : vector<16x128xi1>, vector<16x128xf32>
    %c1_i32_68 = arith.constant 1 : i32
    %c16_i32_69 = arith.constant 16 : i32
    %166 = arith.muli %c1_i32_68, %c16_i32_69 : i32
    %167 = tpu.assume_multiple %166, 16 : i32
    %168 = arith.index_cast %167 : i32 to index
    %c0_70 = arith.constant 0 : index
    %169 = vector.load %arg13[%168, %c0_70] : memref<64x128xf32, #tpu.memory_space<vmem>>, vector<16x128xf32>
    %170 = arith.subf %169, %165 : vector<16x128xf32>
    %cst_71 = arith.constant 5.000000e-01 : f32
    %171 = vector.broadcast %cst_71 : f32 to vector<16x128xf32>
    %172 = arith.mulf %170, %171 : vector<16x128xf32>
    %173 = arith.addf %165, %172 : vector<16x128xf32>
    %cst_72 = arith.constant 1.000000e+00 : f32
    %174 = vector.broadcast %cst_72 : f32 to vector<16x128xf32>
    %175 = arith.cmpf oge, %173, %174 : vector<16x128xf32>
    %176 = arith.extui %175 : vector<16x128xi1> to vector<16x128xi32>
    %177 = arith.sitofp %176 : vector<16x128xi32> to vector<16x128xf32>
    %178 = arith.addf %163, %177 : vector<16x128xf32>
    %cst_73 = arith.constant 0.000000e+00 : f32
    %179 = vector.broadcast %cst_73 : f32 to vector<16x128xf32>
    %180 = arith.select %175, %179, %173 : vector<16x128xi1>, vector<16x128xf32>
    %c2_i32_74 = arith.constant 2 : i32
    %c16_i32_75 = arith.constant 16 : i32
    %181 = arith.muli %c2_i32_74, %c16_i32_75 : i32
    %182 = tpu.assume_multiple %181, 16 : i32
    %183 = arith.index_cast %182 : i32 to index
    %c0_76 = arith.constant 0 : index
    %184 = vector.load %arg13[%183, %c0_76] : memref<64x128xf32, #tpu.memory_space<vmem>>, vector<16x128xf32>
    %185 = arith.subf %184, %180 : vector<16x128xf32>
    %cst_77 = arith.constant 5.000000e-01 : f32
    %186 = vector.broadcast %cst_77 : f32 to vector<16x128xf32>
    %187 = arith.mulf %185, %186 : vector<16x128xf32>
    %188 = arith.addf %180, %187 : vector<16x128xf32>
    %cst_78 = arith.constant 1.000000e+00 : f32
    %189 = vector.broadcast %cst_78 : f32 to vector<16x128xf32>
    %190 = arith.cmpf oge, %188, %189 : vector<16x128xf32>
    %191 = arith.extui %190 : vector<16x128xi1> to vector<16x128xi32>
    %192 = arith.sitofp %191 : vector<16x128xi32> to vector<16x128xf32>
    %193 = arith.addf %178, %192 : vector<16x128xf32>
    %cst_79 = arith.constant 0.000000e+00 : f32
    %194 = vector.broadcast %cst_79 : f32 to vector<16x128xf32>
    %195 = arith.select %190, %194, %188 : vector<16x128xi1>, vector<16x128xf32>
    %c3_i32_80 = arith.constant 3 : i32
    %c16_i32_81 = arith.constant 16 : i32
    %196 = arith.muli %c3_i32_80, %c16_i32_81 : i32
    %197 = tpu.assume_multiple %196, 16 : i32
    %198 = arith.index_cast %197 : i32 to index
    %c0_82 = arith.constant 0 : index
    %199 = vector.load %arg13[%198, %c0_82] : memref<64x128xf32, #tpu.memory_space<vmem>>, vector<16x128xf32>
    %200 = arith.subf %199, %195 : vector<16x128xf32>
    %cst_83 = arith.constant 5.000000e-01 : f32
    %201 = vector.broadcast %cst_83 : f32 to vector<16x128xf32>
    %202 = arith.mulf %200, %201 : vector<16x128xf32>
    %203 = arith.addf %195, %202 : vector<16x128xf32>
    %cst_84 = arith.constant 1.000000e+00 : f32
    %204 = vector.broadcast %cst_84 : f32 to vector<16x128xf32>
    %205 = arith.cmpf oge, %203, %204 : vector<16x128xf32>
    %206 = arith.extui %205 : vector<16x128xi1> to vector<16x128xi32>
    %207 = arith.sitofp %206 : vector<16x128xi32> to vector<16x128xf32>
    %208 = arith.addf %193, %207 : vector<16x128xf32>
    %cst_85 = arith.constant 0.000000e+00 : f32
    %209 = vector.broadcast %cst_85 : f32 to vector<16x128xf32>
    %210 = arith.select %205, %209, %203 : vector<16x128xi1>, vector<16x128xf32>
    %c4_i32_86 = arith.constant 4 : i32
    %cst_87 = arith.constant 2.500000e-01 : f32
    %211 = vector.broadcast %cst_87 : f32 to vector<16x128xf32>
    %212 = arith.mulf %208, %211 : vector<16x128xf32>
    %c0_88 = arith.constant 0 : index
    %c0_89 = arith.constant 0 : index
    %213 = vector.load %arg9[%c0_88, %c0_89] : memref<1x128xf32, #tpu.memory_space<vmem>>, vector<1x128xf32>
    %c0_90 = arith.constant 0 : index
    %c0_91 = arith.constant 0 : index
    %214 = vector.load %arg10[%c0_90, %c0_91] : memref<1x128xf32, #tpu.memory_space<vmem>>, vector<1x128xf32>
    %cst_92 = arith.constant dense<0.000000e+00> : vector<128xf32>
    %215 = vector.multi_reduction <add>, %212, %cst_92 [0] : vector<16x128xf32> to vector<128xf32>
    %216 = vector.shape_cast %215 : vector<128xf32> to vector<1x128xf32>
    %217 = arith.mulf %212, %212 : vector<16x128xf32>
    %cst_93 = arith.constant dense<0.000000e+00> : vector<128xf32>
    %218 = vector.multi_reduction <add>, %217, %cst_93 [0] : vector<16x128xf32> to vector<128xf32>
    %219 = vector.shape_cast %218 : vector<128xf32> to vector<1x128xf32>
    %cst_94 = arith.constant 6.250000e-02 : f32
    %220 = vector.broadcast %cst_94 : f32 to vector<1x128xf32>
    %221 = arith.mulf %216, %220 : vector<1x128xf32>
    %cst_95 = arith.constant 6.250000e-02 : f32
    %222 = vector.broadcast %cst_95 : f32 to vector<1x128xf32>
    %223 = arith.mulf %219, %222 : vector<1x128xf32>
    %224 = arith.mulf %221, %221 : vector<1x128xf32>
    %225 = arith.subf %223, %224 : vector<1x128xf32>
    %cst_96 = arith.constant 0.000000e+00 : f32
    %226 = vector.broadcast %cst_96 : f32 to vector<1x128xf32>
    %227 = arith.maximumf %225, %226 : vector<1x128xf32>
    %228 = vector.broadcast %221 : vector<1x128xf32> to vector<16x128xf32>
    %229 = arith.subf %212, %228 : vector<16x128xf32>
    %cst_97 = arith.constant 9.99999974E-6 : f32
    %230 = vector.broadcast %cst_97 : f32 to vector<1x128xf32>
    %231 = arith.addf %227, %230 : vector<1x128xf32>
    %232 = math.rsqrt %231 : vector<1x128xf32>
    %233 = arith.mulf %232, %213 : vector<1x128xf32>
    %234 = vector.broadcast %233 : vector<1x128xf32> to vector<16x128xf32>
    %235 = arith.mulf %229, %234 : vector<16x128xf32>
    %236 = vector.broadcast %214 : vector<1x128xf32> to vector<16x128xf32>
    %237 = arith.addf %235, %236 : vector<16x128xf32>
    %c0_98 = arith.constant 0 : index
    %c0_99 = arith.constant 0 : index
    %238 = vector.load %arg11[%c0_98, %c0_99] : memref<16x128xf32, #tpu.memory_space<vmem>>, vector<16x128xf32>
    tpu.vector_store %arg11[%c0_98, %c0_99], %237 {strides = array<i32>} : memref<16x128xf32, #tpu.memory_space<vmem>>, vector<16x128xf32>,
    return
  }
}

</mosaic_0001>

<bundles_post_ra>
// kernel: reverse.1
= control target key start
LH: loop header
LB: loop body
LE: loop exit
PB: predicated region body
PF: predicated region fallthrough
CT: control target
= control target key end

     0   :  { %v58_v2 = vld [vmem:[#allocation1 + $0x8] sm:$0xf]  ;;  %v65_v3 = vld [vmem:[#allocation1] sm:$0xf]  ;;  %v75_v6 = vlaneseq  ;;  %s185_s0 = inlined_call_operand.vmem [shape: f32[2,128,3], index: 0, kind: input, shape index: {}]   ;;  %s186_s1 = inlined_call_operand.vmem [shape: f32[2,128,3], index: 1, kind: output, shape index: {}]  }
   0x1   :  { %v19_v0 = vld [vmem:[%s185_s0] sm:$0xf]  ;;  %v21_v1 = vld [vmem:[%s185_s0 + $0x4] sm:$0xf]  ;;  %60 = vst [vmem:[#allocation0 + $0x10] sm:$0xf] %v58_v2 }
   0x2   :  { %20 = vst [vmem:[#allocation1 + $0x4] sm:$0xf] %v19_v0  ;;  %22 = vst [vmem:[#allocation1 + $0xc] sm:$0xf] %v21_v1  ;;  %v76_v11 = vshrl.u32 %v75_v6, 7 }
   0x3   :  { %66 = vst [vmem:[#allocation0] sm:$0xf] %v65_v3 }
   0x4   :  { %vm77_vm0 = vcmp.lt.s32.totalorder %v76_v11, 3 }
   0x8   :  { %v82_v7 = vld [vmem:[#allocation0 + $0x17] ss:$-1 sm:$0xff] }
   0x9   :  { %v53_v4 = vld [vmem:[#allocation1 + $0xc] sm:$0xf]  ;;  %v62_v5 = vld [vmem:[#allocation1 + $0x4] sm:$0xf]  ;;  %v83_v9 = vrot.slane %v82_v7, 5 }
   0xa   :  { %55 = vst [vmem:[#allocation0 + $0x18] sm:$0xf] %v53_v4  ;;  %64 = vst [vmem:[#allocation0 + $0x8] sm:$0xf] %v62_v5  ;;  %v68_v8 = vld [vmem:[#allocation0 + $0x7] ss:$-1 sm:$0xff] }
   0xb   :  { %v69_v10 = vrot.slane %v68_v8, 5  ;;  %84 = vst [vmem:[#allocation2 + $0x8] sm:$0xff] %v83_v9 }
   0xd   :  { %70 = vst [vmem:[#allocation2] sm:$0xff] %v69_v10 }
  0x11   :  { %v73_v12 = vld [vmem:[#allocation0 + $0xf] ss:$-1 sm:$0xff]  ;;  %v87_v13 = vld [vmem:[#allocation0 + $0x1f] ss:$-1 sm:$0xff] }
  0x12   :  { %v74_v14 = vrot.slane %v73_v12, 5  ;;  %v88_v15 = vrot.slane %v87_v13, 5 }
  0x14   :  { %78 = vst.msk [vmem:[#allocation2] sm:$0xff] %vm77_vm0, %v74_v14  ;;  %92 = vst.msk [vmem:[#allocation2 + $0x8] sm:$0xff] %vm77_vm0, %v88_v15 }
  0x1b   :  { %v97_v16 = vld [vmem:[#allocation2] sm:$0xf]  ;;  %v102_v17 = vld [vmem:[#allocation2 + $0x8] sm:$0xf] }
  0x1c   :  { %100 = vst [vmem:[#allocation3] sm:$0xf] %v97_v16  ;;  %106 = vst [vmem:[#allocation3 + $0x4] sm:$0xf] %v102_v17 }
  0x23   :  { %v123_v18 = vld [vmem:[#allocation3] sm:$0xff]  }
  0x24   :  { %124 = vst [vmem:[%s186_s1] sm:$0xff] %v123_v18  }

// kernel: ssr_layer_forward.1
= control target key start
LH: loop header
LB: loop body
LE: loop exit
PB: predicated region body
PF: predicated region fallthrough
CT: control target
= control target key end

     0   :  { %v1992_v2 = vmov 0   ;;  %s2518_s0 = inlined_call_operand.vmem [shape: f32[16,128], index: 0, kind: input, shape index: {}]   ;;  %s2519_s1 = inlined_call_operand.vmem [shape: f32[1,128], index: 1, kind: input, shape index: {}]   ;;  %s2520_s2 = inlined_call_operand.vmem [shape: f32[1,128], index: 2, kind: input, shape index: {}]   ;;  %s2521_s3 = inlined_call_operand.vmem [shape: bf16[128,512], index: 3, kind: input, shape index: {}]   ;;  %s2522_s4 = inlined_call_operand.vmem [shape: f32[1,512], index: 4, kind: input, shape index: {}]   ;;  %s2523_s5 = inlined_call_operand.vmem [shape: f32[1,512], index: 5, kind: input, shape index: {}]   ;;  %s2524_s6 = inlined_call_operand.vmem [shape: bf16[512,128], index: 6, kind: input, shape index: {}]   ;;  %s2525_s7 = inlined_call_operand.vmem [shape: f32[1,128], index: 7, kind: input, shape index: {}]   ;;  %s2526_s8 = inlined_call_operand.vmem [shape: f32[1,128], index: 8, kind: input, shape index: {}]   ;;  %s2527_s9 = inlined_call_operand.vmem [shape: f32[1,128], index: 9, kind: input, shape index: {}]   ;;  %s2528_s10 = inlined_call_operand.vmem [shape: f32[1,128], index: 10, kind: input, shape index: {}]   ;;  %s2529_s11 = inlined_call_operand.hbm [shape: f32[16,128], index: 11, kind: output, shape index: {}]  }
   0x1   :  { %v1876_v0 = vld [vmem:[%s2521_s3 + $0xe4] ss:$16 sps:$4 sm:$0xff]   ;;  %v1878_v1 = vld [vmem:[%s2521_s3 + $0xec] ss:$16 sps:$4 sm:$0xff]   ;;  %309 = vmatprep.mubr.bf16.mxu0 %v1992_v2  ;;  %352 = vmatprep.mubr.bf16.mxu1 %v1992_v2  ;;  %v1880_v3 = vld [vmem:[%s2521_s3 + $0xe0] ss:$16 sps:$4 sm:$0xff]  }
   0x2   :  { %277 = vmatprep.subr.bf16.mxu0 %v1876_v0  ;;  %v1881_v4 = vld [vmem:[%s2521_s3 + $0xe8] ss:$16 sps:$4 sm:$0xff]   ;;  %320 = vmatprep.subr.bf16.mxu1 %v1878_v1  ;;  %v1882_v5 = vld [vmem:[%s2521_s3 + $0xc4] ss:$16 sps:$4 sm:$0xff]   ;;  %v1884_v6 = vld [vmem:[%s2521_s3 + $0xcc] ss:$16 sps:$4 sm:$0xff]  }
   0x3   :  { %278 = vmatpush1.bf16.msra.mxu0 %v1880_v3  ;;  %321 = vmatpush1.bf16.msra.mxu1 %v1881_v4  ;;  %v1886_v7 = vld [vmem:[%s2521_s3 + $0xc0] ss:$16 sps:$4 sm:$0xff]   ;;  %v1887_v8 = vld [vmem:[%s2521_s3 + $0xc8] ss:$16 sps:$4 sm:$0xff]   ;;  %v1888_v9 = vld [vmem:[%s2521_s3 + $0xa4] ss:$16 sps:$4 sm:$0xff]  }
   0x4   :  { %279 = vmatprep.subr.bf16.mxu0 %v1882_v5  ;;  %322 = vmatprep.subr.bf16.mxu1 %v1884_v6  ;;  %v1890_v10 = vld [vmem:[%s2521_s3 + $0xac] ss:$16 sps:$4 sm:$0xff]   ;;  %v1892_v11 = vld [vmem:[%s2521_s3 + $0xa0] ss:$16 sps:$4 sm:$0xff]   ;;  %v1893_v12 = vld [vmem:[%s2521_s3 + $0xa8] ss:$16 sps:$4 sm:$0xff]  }
   0x5   :  { %v1894_v13 = vld [vmem:[%s2521_s3 + $0x84] ss:$16 sps:$4 sm:$0xff]   ;;  %v1896_v14 = vld [vmem:[%s2521_s3 + $0x8c] ss:$16 sps:$4 sm:$0xff]   ;;  %v1898_v15 = vld [vmem:[%s2521_s3 + $0x80] ss:$16 sps:$4 sm:$0xff]  }
   0x6   :  { %v1899_v16 = vld [vmem:[%s2521_s3 + $0x88] ss:$16 sps:$4 sm:$0xff]   ;;  %v1900_v17 = vld [vmem:[%s2521_s3 + $0x64] ss:$16 sps:$4 sm:$0xff]   ;;  %v1902_v18 = vld [vmem:[%s2521_s3 + $0x6c] ss:$16 sps:$4 sm:$0xff]  }
   0x7   :  { %280 = vmatpush1.bf16.msra.mxu0 %v1886_v7  ;;  %323 = vmatpush1.bf16.msra.mxu1 %v1887_v8  ;;  %v1904_v19 = vld [vmem:[%s2521_s3 + $0x60] ss:$16 sps:$4 sm:$0xff]   ;;  %v1905_v20 = vld [vmem:[%s2521_s3 + $0x68] ss:$16 sps:$4 sm:$0xff]   ;;  %v1906_v21 = vld [vmem:[%s2521_s3 + $0x44] ss:$16 sps:$4 sm:$0xff]  }
   0x8   :  { %281 = vmatprep.subr.bf16.mxu0 %v1888_v9  ;;  %324 = vmatprep.subr.bf16.mxu1 %v1890_v10  ;;  %v1908_v22 = vld [vmem:[%s2521_s3 + $0x4c] ss:$16 sps:$4 sm:$0xff]   ;;  %v1910_v23 = vld [vmem:[%s2521_s3 + $0x40] ss:$16 sps:$4 sm:$0xff]   ;;  %v1911_v24 = vld [vmem:[%s2521_s3 + $0x48] ss:$16 sps:$4 sm:$0xff]  }
   0x9   :  { %v1912_v25 = vld [vmem:[%s2521_s3 + $0x24] ss:$16 sps:$4 sm:$0xff]   ;;  %v1914_v26 = vld [vmem:[%s2521_s3 + $0x2c] ss:$16 sps:$4 sm:$0xff]   ;;  %v1916_v29 = vld [vmem:[%s2521_s3 + $0x20] ss:$16 sps:$4 sm:$0xff]  }
   0xa   :  { %v40_v27 = vld [vmem:[%s2518_s0] sm:$0xff]  ;;  %v41_v28 = vld [vmem:[%s2518_s0 + $0x8] sm:$0xff] }
   0xb   :  { %282 = vmatpush1.bf16.msra.mxu0 %v1892_v11  ;;  %325 = vmatpush1.bf16.msra.mxu1 %v1893_v12  ;;  %v1917_v30 = vld [vmem:[%s2521_s3 + $0x28] ss:$16 sps:$4 sm:$0xff]   ;;  %v44_v31 = vadd.f32 %v41_v28, %v40_v27  ;;  %v51_v32 = vmul.f32 %v40_v27, %v40_v27  ;;  %v52_v33 = vmul.f32 %v41_v28, %v41_v28  ;;  %v1918_v34 = vld [vmem:[%s2521_s3 + $0x4] ss:$16 sps:$4 sm:$0xff]   ;;  %v1920_v35 = vld [vmem:[%s2521_s3 + $0xc] ss:$16 sps:$4 sm:$0xff]  }
   0xc   :  { %283 = vmatprep.subr.bf16.mxu0 %v1894_v13  ;;  %326 = vmatprep.subr.bf16.mxu1 %v1896_v14  ;;  %v1922_v38 = vld [vmem:[%s2521_s3] ss:$16 sps:$4 sm:$0xff]   ;;  %v1923_v39 = vld [vmem:[%s2521_s3 + $0x8] ss:$16 sps:$4 sm:$0xff]  }
   0xd   :  { %v45_v36 = vrot.slane %v44_v31, 4  ;;  %v53_v37 = vadd.f32 %v52_v33, %v51_v32 }
   0xf   :  { %284 = vmatpush1.bf16.msra.mxu0 %v1898_v15  ;;  %327 = vmatpush1.bf16.msra.mxu1 %v1899_v16  ;;  %v46_v40 = vadd.f32 %v45_v36, %v44_v31  ;;  %v54_v41 = vrot.slane %v53_v37, 4 }
  0x10   :  { %285 = vmatprep.subr.bf16.mxu0 %v1900_v17  ;;  %328 = vmatprep.subr.bf16.mxu1 %v1902_v18 }
  0x11   :  { %v47_v42 = vrot.slane %v46_v40, 2  ;;  %v55_v43 = vadd.f32 %v54_v41, %v53_v37 }
  0x13   :  { %286 = vmatpush1.bf16.msra.mxu0 %v1904_v19  ;;  %329 = vmatpush1.bf16.msra.mxu1 %v1905_v20  ;;  %v48_v44 = vadd.f32 %v47_v42, %v46_v40  ;;  %v56_v45 = vrot.slane %v55_v43, 2 }
  0x14   :  { %287 = vmatprep.subr.bf16.mxu0 %v1906_v21  ;;  %330 = vmatprep.subr.bf16.mxu1 %v1908_v22 }
  0x15   :  { %v49_v46 = vrot.slane %v48_v44, 1  ;;  %v57_v47 = vadd.f32 %v56_v45, %v55_v43 }
  0x17   :  { %288 = vmatpush1.bf16.msra.mxu0 %v1910_v23  ;;  %331 = vmatpush1.bf16.msra.mxu1 %v1911_v24  ;;  %v50_v48 = vadd.f32 %v49_v46, %v48_v44  ;;  %v58_v49 = vrot.slane %v57_v47, 1 }
  0x18   :  { %289 = vmatprep.subr.bf16.mxu0 %v1912_v25  ;;  %332 = vmatprep.subr.bf16.mxu1 %v1914_v26 }
  0x19   :  { %v59_v50 = vadd.f32 %v58_v49, %v57_v47  ;;  %v60_v51 = vmul.f32 0.0625, %v50_v48 }
  0x1b   :  { %290 = vmatpush1.bf16.msra.mxu0 %v1916_v29  ;;  %333 = vmatpush1.bf16.msra.mxu1 %v1917_v30  ;;  %v61_v52 = vmul.f32 0.0625, %v59_v50  ;;  %v62_v53 = vmul.f32 %v60_v51, %v60_v51 }
  0x1c   :  { %291 = vmatprep.subr.bf16.mxu0 %v1918_v34  ;;  %334 = vmatprep.subr.bf16.mxu1 %v1920_v35 }
  0x1d   :  { %v63_v54 = vsub.f32 %v61_v52, %v62_v53 }
  0x1f   :  { %292 = vmatpush1.bf16.msra.mxu0 %v1922_v38  ;;  %335 = vmatpush1.bf16.msra.mxu1 %v1923_v39  ;;  %v64_v55 = vmax.f32 %v63_v54, 0.0 }
  0x21   :  { %v67_v56 = vadd.f32 1e-05, %v64_v55 }
  0x23   :  { %1956 = vrsqrt.f32 %v67_v56 }
  0x24   :  { %16 = vsyncpa [#allocation5], 0  ;;  %v70_v57 = vlaneseq  ;;  %v42_v59 = vld [vmem:[%s2519_s1] sm:$0x1]  ;;  %v65_v62 = vsub.f32 %v40_v27, %v60_v51  ;;  %v66_v63 = vsub.f32 %v41_v28, %v60_v51  ;;  %v1924_v8 = vld [vmem:[%s2524_s6 + $0x78] sm:$0xff]   ;;  %s1995_s12 = smov [#allocation4]  }
  0x25   :  { %v1587_v2 = vld [vmem:[%s2520_s2] ss:$0 sm:$0xff]  ;;  %v1925_v9 = vld [vmem:[%s2524_s6 + $0xf8] sm:$0xff]   ;;  %1790 = vmatprep.subr.bf16.mxu0 %v1924_v8  ;;  %v1928_v12 = vld [vmem:[%s2524_s6 + $0x70] sm:$0xff]   ;;  %s1573_s13 = sshll.u32 %s1995_s12, 4  ;;  %s1574_s13 = int_to_ptr.vmem [resolvable:$true] %s1573_s13 }
  0x26   :  { %v2160_v58 = vshrl.u32 %v70_v57, 7  ;;  %v1926_v10 = vld [vmem:[%s2524_s6 + $0x38] sm:$0xff]   ;;  %1830 = vmatprep.subr.bf16.mxu1 %v1925_v9  ;;  %v1929_v13 = vld [vmem:[%s2524_s6 + $0xf0] sm:$0xff]   ;;  %v1932_v16 = vld [vmem:[%s2524_s6 + $0x68] sm:$0xff]   ;;  %p1975_p1 = scmp.lt.s32.totalorder %s1574_s13, %s1574_s13 }
  0x27   :  { %v1927_v11 = vld [vmem:[%s2524_s6 + $0xb8] sm:$0xff]   ;;  %v1930_v14 = vld [vmem:[%s2524_s6 + $0x30] sm:$0xff]   ;;  %v1933_v17 = vld [vmem:[%s2524_s6 + $0xe8] sm:$0xff]  }
  0x28   :  { %v2166_v60 = vsub.s32 0, %v2160_v58  ;;  %v1931_v15 = vld [vmem:[%s2524_s6 + $0xb0] sm:$0xff]   ;;  %v1934_v18 = vld [vmem:[%s2524_s6 + $0x28] sm:$0xff]   ;;  %v1936_v20 = vld [vmem:[%s2524_s6 + $0x60] sm:$0xff]  }
  0x29   :  { %v1935_v19 = vld [vmem:[%s2524_s6 + $0xa8] sm:$0xff]   ;;  %v1937_v21 = vld [vmem:[%s2524_s6 + $0xe0] sm:$0xff]   ;;  %v1940_v24 = vld [vmem:[%s2524_s6 + $0x58] sm:$0xff]  }
  0x2a   :  { %v1938_v22 = vld [vmem:[%s2524_s6 + $0x20] sm:$0xff]   ;;  %v1941_v25 = vld [vmem:[%s2524_s6 + $0xd8] sm:$0xff]   ;;  %v1944_v28 = vld [vmem:[%s2524_s6 + $0x50] sm:$0xff]  }
  0x2b   :  { %v1939_v23 = vld [vmem:[%s2524_s6 + $0xa0] sm:$0xff]   ;;  %v1942_v26 = vld [vmem:[%s2524_s6 + $0x18] sm:$0xff]   ;;  %v1945_v29 = vld [vmem:[%s2524_s6 + $0xd0] sm:$0xff]  }
  0x2c   :  { %v1943_v27 = vld [vmem:[%s2524_s6 + $0x98] sm:$0xff]   ;;  %v1946_v30 = vld [vmem:[%s2524_s6 + $0x10] sm:$0xff]   ;;  %v1948_v32 = vld [vmem:[%s2524_s6 + $0x48] sm:$0xff]  }
  0x2d   :  { %v1947_v31 = vld [vmem:[%s2524_s6 + $0x90] sm:$0xff]   ;;  %v1949_v33 = vld [vmem:[%s2524_s6 + $0xc8] sm:$0xff]   ;;  %v1952_v36 = vld [vmem:[%s2524_s6 + $0x40] sm:$0xff]  }
  0x2e   :  { %v1950_v34 = vld [vmem:[%s2524_s6 + $0x8] sm:$0xff]   ;;  %v1953_v37 = vld [vmem:[%s2524_s6 + $0xc0] sm:$0xff]  }
  0x2f   :  { %v1951_v35 = vld [vmem:[%s2524_s6 + $0x88] sm:$0xff]   ;;  %v1954_v38 = vld [vmem:[%s2524_s6] sm:$0xff]  }
  0x30   :  { %v1957_v61 = vpop.eup %1956  ;;  %v1955_v39 = vld [vmem:[%s2524_s6 + $0x80] sm:$0xff]  }
  0x31   :  { %v69_v0 = vmul.f32 %v1957_v61, %v42_v59 }
  0x33   :  { %v73_v1 = vrot.slane %v69_v0, %v2166_v60 }
  0x35   :  { %v74_v3 = vmul.f32 %v73_v1, %v65_v62  ;;  %v75_v4 = vmul.f32 %v73_v1, %v66_v63 }
  0x37   :  { %v2172_v5 = vadd.f32 %v1587_v2, %v74_v3  ;;  %v2174_v6 = vadd.f32 %v1587_v2, %v75_v4 }
  0x39   :  { %v84_v7 = vpack.c.bf16 %v2174_v6, %v2172_v5 }
  0x3b   :  { %310 = vmatmul.mubr.bf16.vlgmr.msra.gmra.mxu0 %v84_v7  ;;  %353 = vmatmul.mubr.bf16.vlgmr.msra.gmra.mxu1 %v84_v7 }
  0x3c   :  { %1791 = vmatpush3.bf16.msra.mxu0 %v1926_v10  ;;  %1831 = vmatpush3.bf16.msra.mxu1 %v1927_v11 }
  0x3d   :  { %1792 = vmatprep.subr.bf16.mxu0 %v1928_v12  ;;  %1832 = vmatprep.subr.bf16.mxu1 %v1929_v13 }
  0x40   :  { %1793 = vmatpush3.bf16.msra.mxu0 %v1930_v14  ;;  %1833 = vmatpush3.bf16.msra.mxu1 %v1931_v15 }
  0x41   :  { %1794 = vmatprep.subr.bf16.mxu0 %v1932_v16  ;;  %1834 = vmatprep.subr.bf16.mxu1 %v1933_v17 }
  0x44   :  { %1795 = vmatpush3.bf16.msra.mxu0 %v1934_v18  ;;  %1835 = vmatpush3.bf16.msra.mxu1 %v1935_v19 }
  0x45   :  { %1796 = vmatprep.subr.bf16.mxu0 %v1936_v20  ;;  %1836 = vmatprep.subr.bf16.mxu1 %v1937_v21 }
  0x48   :  { %1797 = vmatpush3.bf16.msra.mxu0 %v1938_v22  ;;  %1837 = vmatpush3.bf16.msra.mxu1 %v1939_v23 }
  0x49   :  { %1798 = vmatprep.subr.bf16.mxu0 %v1940_v24  ;;  %1838 = vmatprep.subr.bf16.mxu1 %v1941_v25 }
  0x4c   :  { %1799 = vmatpush3.bf16.msra.mxu0 %v1942_v26  ;;  %1839 = vmatpush3.bf16.msra.mxu1 %v1943_v27 }
  0x4d   :  { %1800 = vmatprep.subr.bf16.mxu0 %v1944_v28  ;;  %1840 = vmatprep.subr.bf16.mxu1 %v1945_v29 }
  0x50   :  { %1801 = vmatpush3.bf16.msra.mxu0 %v1946_v30  ;;  %1841 = vmatpush3.bf16.msra.mxu1 %v1947_v31 }
  0x51   :  { %1802 = vmatprep.subr.bf16.mxu0 %v1948_v32  ;;  %1842 = vmatprep.subr.bf16.mxu1 %v1949_v33 }
  0x54   :  { %1803 = vmatpush3.bf16.msra.mxu0 %v1950_v34  ;;  %1843 = vmatpush3.bf16.msra.mxu1 %v1951_v35 }
  0x55   :  { %1804 = vmatprep.subr.bf16.mxu0 %v1952_v36  ;;  %1844 = vmatprep.subr.bf16.mxu1 %v1953_v37 }
  0x58   :  { %1805 = vmatpush3.bf16.msra.mxu0 %v1954_v38  ;;  %1845 = vmatpush3.bf16.msra.mxu1 %v1955_v39 }
  0xfb   :  { %v2274_v40 = vpop.f32.mrf.mxu0  ;;  %v2276_v41 = vpop.f32.mrf.mxu1 }
  0xfc   :  { %v393_v44 = vmul.f32 %v2274_v40, %v2274_v40  ;;  %v395_v45 = vmul.f32 %v2276_v41, %v2276_v41 }
  0xfd   :  { %v2278_v42 = vpop.f32.mrf.mxu0  ;;  %v2280_v43 = vpop.f32.mrf.mxu1 }
  0xfe   :  { %v394_v52 = vmul.f32 %v2278_v42, %v2278_v42  ;;  %v396_v53 = vmul.f32 %v2280_v43, %v2280_v43 }
  0xff   :  { %v2286_v46 = vpop.f32.mrf.mxu0  ;;  %v2288_v47 = vpop.f32.mrf.mxu1 }
 0x100   :  { %v365_v48 = vadd.f32 %v2286_v46, %v2274_v40  ;;  %v397_v49 = vmul.f32 %v2286_v46, %v2286_v46  ;;  %v379_v50 = vadd.f32 %v2288_v47, %v2276_v41  ;;  %v399_v51 = vmul.f32 %v2288_v47, %v2288_v47 }
 0x101   :  { %v2302_v54 = vpop.f32.mrf.mxu0  ;;  %v2304_v55 = vpop.f32.mrf.mxu1 }
 0x102   :  { %v366_v56 = vrot.slane %v365_v48, 4  ;;  %v401_v57 = vadd.f32 %v397_v49, %v393_v44  ;;  %v380_v59 = vrot.slane %v379_v50, 4  ;;  %v415_v61 = vadd.f32 %v399_v51, %v395_v45 }
 0x103   :  { %v372_v62 = vadd.f32 %v2302_v54, %v2278_v42  ;;  %v398_v63 = vmul.f32 %v2302_v54, %v2302_v54  ;;  %v386_v0 = vadd.f32 %v2304_v55, %v2280_v43  ;;  %v400_v1 = vmul.f32 %v2304_v55, %v2304_v55 }
 0x104   :  { %v367_v2 = vadd.f32 %v366_v56, %v365_v48  ;;  %v402_v3 = vrot.slane %v401_v57, 4  ;;  %v381_v4 = vadd.f32 %v380_v59, %v379_v50  ;;  %v416_v7 = vrot.slane %v415_v61, 4 }
 0x105   :  { %v373_v8 = vrot.slane %v372_v62, 4  ;;  %v408_v9 = vadd.f32 %v398_v63, %v394_v52  ;;  %v387_v10 = vrot.slane %v386_v0, 4  ;;  %v422_v11 = vadd.f32 %v400_v1, %v396_v53 }
 0x106   :  { %v368_v12 = vrot.slane %v367_v2, 2  ;;  %v403_v13 = vadd.f32 %v402_v3, %v401_v57  ;;  %v382_v14 = vrot.slane %v381_v4, 2  ;;  %v417_v15 = vadd.f32 %v416_v7, %v415_v61 }
 0x107   :  { %v374_v16 = vadd.f32 %v373_v8, %v372_v62  ;;  %v409_v17 = vrot.slane %v408_v9, 4  ;;  %v388_v18 = vadd.f32 %v387_v10, %v386_v0  ;;  %v423_v19 = vrot.slane %v422_v11, 4 }
 0x108   :  { %v369_v20 = vadd.f32 %v368_v12, %v367_v2  ;;  %v404_v21 = vrot.slane %v403_v13, 2  ;;  %v383_v22 = vadd.f32 %v382_v14, %v381_v4  ;;  %v418_v23 = vrot.slane %v417_v15, 2 }
 0x109   :  { %v375_v24 = vrot.slane %v374_v16, 2  ;;  %v410_v25 = vadd.f32 %v409_v17, %v408_v9  ;;  %v389_v26 = vrot.slane %v388_v18, 2  ;;  %v424_v27 = vadd.f32 %v423_v19, %v422_v11 }
 0x10a   :  { %v370_v28 = vrot.slane %v369_v20, 1  ;;  %v405_v29 = vadd.f32 %v404_v21, %v403_v13  ;;  %v384_v30 = vrot.slane %v383_v22, 1  ;;  %v419_v31 = vadd.f32 %v418_v23, %v417_v15 }
 0x10b   :  { %v376_v32 = vadd.f32 %v375_v24, %v374_v16  ;;  %v411_v33 = vrot.slane %v410_v25, 2  ;;  %v390_v34 = vadd.f32 %v389_v26, %v388_v18  ;;  %v425_v35 = vrot.slane %v424_v27, 2  ;;  %v363_v24 = vld [vmem:[%s2522_s4] sm:$0xf] }
 0x10c   :  { %v371_v36 = vadd.f32 %v370_v28, %v369_v20  ;;  %v406_v37 = vrot.slane %v405_v29, 1  ;;  %v385_v38 = vadd.f32 %v384_v30, %v383_v22  ;;  %v420_v39 = vrot.slane %v419_v31, 1  ;;  %v364_v28 = vld [vmem:[%s2523_s5] sm:$0xf] }
 0x10d   :  { %v377_v44 = vrot.slane %v376_v32, 1  ;;  %v412_v45 = vadd.f32 %v411_v33, %v410_v25  ;;  %v391_v48 = vrot.slane %v390_v34, 1  ;;  %v426_v49 = vadd.f32 %v425_v35, %v424_v27 }
 0x10e   :  { %v407_v50 = vadd.f32 %v406_v37, %v405_v29  ;;  %v429_v51 = vmul.f32 0.0625, %v371_v36  ;;  %v421_v52 = vadd.f32 %v420_v39, %v419_v31  ;;  %v2314_v53 = vmul.f32 0.0625, %v385_v38 }
 0x10f   :  { %v378_v56 = vadd.f32 %v377_v44, %v376_v32  ;;  %v413_v57 = vrot.slane %v412_v45, 1  ;;  %v392_v59 = vadd.f32 %v391_v48, %v390_v34  ;;  %v427_v61 = vrot.slane %v426_v49, 1 }
 0x110   :  { %v433_v62 = vmul.f32 0.0625, %v407_v50  ;;  %v437_v63 = vmul.f32 %v429_v51, %v429_v51  ;;  %v435_v0 = vmul.f32 0.0625, %v421_v52  ;;  %v439_v1 = vmul.f32 %v2314_v53, %v2314_v53 }
 0x111   :  { %v414_v3 = vadd.f32 %v413_v57, %v412_v45  ;;  %v2318_v4 = vmul.f32 0.0625, %v378_v56  ;;  %v428_v7 = vadd.f32 %v427_v61, %v426_v49  ;;  %v2320_v9 = vmul.f32 0.0625, %v392_v59 }
 0x112   :  { %v441_v2 = vsub.f32 %v433_v62, %v437_v63  ;;  %v443_v8 = vsub.f32 %v435_v0, %v439_v1  ;;  %v476_v25 = vsub.s32 2, %v2160_v58  ;;  %v469_v26 = vrot.slane %v363_v24, %v2166_v60 }
 0x113   :  { %v434_v11 = vmul.f32 0.0625, %v414_v3  ;;  %v438_v12 = vmul.f32 %v2318_v4, %v2318_v4  ;;  %v436_v14 = vmul.f32 0.0625, %v428_v7  ;;  %v440_v15 = vmul.f32 %v2320_v9, %v2320_v9 }
 0x114   :  { %v445_v10 = vmax.f32 %v441_v2, 0.0  ;;  %v447_v13 = vmax.f32 %v443_v8, 0.0  ;;  %v472_v27 = vsub.s32 1, %v2160_v58  ;;  %v477_v29 = vrot.slane %v363_v24, %v476_v25 }
 0x115   :  { %v442_v17 = vsub.f32 %v434_v11, %v438_v12  ;;  %v444_v19 = vsub.f32 %v436_v14, %v440_v15  ;;  %v480_v30 = vsub.s32 3, %v2160_v58  ;;  %v518_v34 = vrot.slane %v364_v28, %v2166_v60 }
 0x116   :  { %v457_v16 = vadd.f32 1e-05, %v445_v10  ;;  %v459_v18 = vadd.f32 1e-05, %v447_v13  ;;  %v473_v35 = vrot.slane %v363_v24, %v472_v27  ;;  %v526_v37 = vrot.slane %v364_v28, %v476_v25 }
 0x117   :  { %v446_v20 = vmax.f32 %v442_v17, 0.0  ;;  %v448_v21 = vmax.f32 %v444_v19, 0.0  ;;  %v522_v38 = vrot.slane %v364_v28, %v472_v27  ;;  %v481_v39 = vrot.slane %v363_v24, %v480_v30 }
 0x118   :  { %1958 = vrsqrt.f32 %v457_v16  ;;  %v449_v44 = vsub.f32 %v2274_v40, %v429_v51  ;;  %v453_v45 = vsub.f32 %v2286_v46, %v429_v51  ;;  %v530_v49 = vrot.slane %v364_v28, %v480_v30 }
 0x119   :  { %1960 = vrsqrt.f32 %v459_v18  ;;  %v458_v22 = vadd.f32 1e-05, %v446_v20  ;;  %v460_v23 = vadd.f32 1e-05, %v448_v21  ;;  %v451_v58 = vsub.f32 %v2276_v41, %v2314_v53 }
 0x11a   :  { %v455_v52 = vsub.f32 %v2288_v47, %v2314_v53  ;;  %v450_v40 = vsub.f32 %v2278_v42, %v2318_v4  ;;  %v454_v63 = vsub.f32 %v2302_v54, %v2318_v4  ;;  %v452_v53 = vsub.f32 %v2280_v43, %v2320_v9 }
 0x11b   :  { %1962 = vrsqrt.f32 %v458_v22  ;;  %v456_v42 = vsub.f32 %v2304_v55, %v2320_v9 }
 0x11c   :  { %1964 = vrsqrt.f32 %v460_v23 }
 0x125   :  { %v1959_v31 = vpop.eup %1958 }
 0x126   :  { %v1961_v32 = vpop.eup %1960  ;;  %v486_v33 = vmul.f32 %v1959_v31, %v469_v26  ;;  %v1993_v31 = vmov 1.0|1.0  }
 0x127   :  { %v488_v36 = vmul.f32 %v1961_v32, %v477_v29 }
 0x128   :  { %v493_v48 = vrot.slane %v486_v33, %v2166_v60  ;;  %v1963_v50 = vpop.eup %1962 }
 0x129   :  { %v501_v56 = vrot.slane %v488_v36, %v2166_v60  ;;  %v1965_v57 = vpop.eup %1964  ;;  %v487_v62 = vmul.f32 %v1963_v50, %v473_v35 }
 0x12a   :  { %v506_v59 = vmul.f32 %v493_v48, %v449_v44  ;;  %v510_v61 = vmul.f32 %v493_v48, %v453_v45  ;;  %v489_v0 = vmul.f32 %v1965_v57, %v481_v39 }
 0x12b   :  { %v508_v46 = vmul.f32 %v501_v56, %v451_v58  ;;  %v512_v51 = vmul.f32 %v501_v56, %v455_v52  ;;  %v497_v47 = vrot.slane %v487_v62, %v2166_v60 }
 0x12c   :  { %v2349_v1 = vadd.f32 %v518_v34, %v506_v59  ;;  %v2351_v41 = vadd.f32 %v518_v34, %v510_v61  ;;  %v505_v7 = vrot.slane %v489_v0, %v2166_v60 }
 0x12d   :  { %v2356_v2 = vadd.f32 %v526_v37, %v508_v46  ;;  %v2358_v3 = vadd.f32 %v526_v37, %v512_v51  ;;  %v507_v54 = vmul.f32 %v497_v47, %v450_v40  ;;  %v511_v4 = vmul.f32 %v497_v47, %v454_v63 }
 0x12e   :  { %v543_v8 = vmul.f32 0.5, %v2349_v1  ;;  %v547_v10 = vmul.f32 0.5, %v2351_v41  ;;  %v509_v11 = vmul.f32 %v505_v7, %v452_v53  ;;  %v513_v12 = vmul.f32 %v505_v7, %v456_v42 }
 0x12f   :  { %v545_v13 = vmul.f32 0.5, %v2356_v2  ;;  %v549_v43 = vmul.f32 0.5, %v2358_v3  ;;  %v2367_v14 = vadd.f32 %v522_v38, %v507_v54  ;;  %v2369_v15 = vadd.f32 %v522_v38, %v511_v4 }
 0x130   :  { %vm559_vm0 = vcmp.ge.f32.partialorder %v543_v8, 1.0  ;;  %vm563_vm1 = vcmp.ge.f32.partialorder %v547_v10, 1.0  ;;  %v2371_v55 = vadd.f32 %v530_v49, %v509_v11  ;;  %v2373_v9 = vadd.f32 %v530_v49, %v513_v12 }
 0x131   :  { %vm561_vm2 = vcmp.ge.f32.partialorder %v545_v13, 1.0  ;;  %vm565_vm3 = vcmp.ge.f32.partialorder %v549_v43, 1.0  ;;  %v544_v16 = vmul.f32 0.5, %v2367_v14  ;;  %v548_v17 = vmul.f32 0.5, %v2369_v15  ;;  %vm2385_vm6 = vmpackc.low %vm563_vm1, %vm559_vm0 }
 0x132   :  { %v614_v18 = vsel %vm559_vm0, 0.0, %v543_v8  ;;  %v618_v19 = vsel %vm563_vm1, 0.0, %v547_v10  ;;  %v546_v20 = vmul.f32 0.5, %v2371_v55  ;;  %v550_v21 = vmul.f32 0.5, %v2373_v9  ;;  %vm1776_vm11 = vmpackc.low %vm565_vm3, %vm561_vm2 }
 0x133   :  { %v622_v22 = vsub.f32 %v2349_v1, %v614_v18  ;;  %v626_v23 = vsub.f32 %v2351_v41, %v618_v19  ;;  %vm560_vm4 = vcmp.ge.f32.partialorder %v544_v16, 1.0  ;;  %vm564_vm5 = vcmp.ge.f32.partialorder %v548_v17, 1.0 }
 0x134   :  { %v616_v25 = vsel %vm561_vm2, 0.0, %v545_v13  ;;  %v620_v26 = vsel %vm565_vm3, 0.0, %v549_v43  ;;  %v615_v27 = vsel %vm560_vm4, 0.0, %v544_v16  ;;  %v619_v28 = vsel %vm564_vm5, 0.0, %v548_v17  ;;  %vm1758_vm7 = vmpackc.low %vm564_vm5, %vm560_vm4 }
 0x135   :  { %vm562_vm8 = vcmp.ge.f32.partialorder %v546_v20, 1.0  ;;  %vm566_vm9 = vcmp.ge.f32.partialorder %v550_v21, 1.0  ;;  %v623_v29 = vsub.f32 %v2367_v14, %v615_v27  ;;  %v627_v30 = vsub.f32 %v2369_v15, %v619_v28  ;;  %1759 = vmatprep.mubr.msk.bf16.mxu0 %vm1758_vm7, %v1993_v31 }
 0x136   :  { %v617_v32 = vsel %vm562_vm8, 0.0, %v546_v20  ;;  %v621_v33 = vsel %vm566_vm9, 0.0, %v550_v21  ;;  %vm1774_vm10 = vmpackc.low %vm566_vm9, %vm562_vm8  ;;  %1761 = vmatmul.mubr.msk.bf16.vlgmr.msra.gmra.mxu0 %vm2385_vm6, %v1993_v31  ;;  %v630_v36 = vmul.f32 0.5, %v622_v22  ;;  %v634_v37 = vmul.f32 0.5, %v626_v23 }
 0x137   :  { %v625_v34 = vsub.f32 %v2371_v55, %v617_v32  ;;  %v629_v35 = vsub.f32 %v2373_v9, %v621_v33  ;;  %1775 = vmatprep.mubr.msk.bf16.mxu1 %vm1774_vm10, %v1993_v31  ;;  %v631_v38 = vmul.f32 0.5, %v623_v29  ;;  %v635_v39 = vmul.f32 0.5, %v627_v30 }
 0x138   :  { %1777 = vmatmul.mubr.msk.bf16.vlgmr.msra.gmra.mxu1 %vm1776_vm11, %v1993_v31  ;;  %v624_v44 = vsub.f32 %v2356_v2, %v616_v25  ;;  %v628_v45 = vsub.f32 %v2358_v3, %v620_v26  ;;  %v638_v50 = vadd.f32 %v630_v36, %v614_v18  ;;  %v642_v58 = vadd.f32 %v634_v37, %v618_v19 }
 0x139   :  { %v633_v48 = vmul.f32 0.5, %v625_v34  ;;  %v637_v49 = vmul.f32 0.5, %v629_v35  ;;  %v639_v52 = vadd.f32 %v631_v38, %v615_v27  ;;  %v643_v56 = vadd.f32 %v635_v39, %v619_v28 }
 0x13a   :  { %v632_v57 = vmul.f32 0.5, %v624_v44  ;;  %v636_v59 = vmul.f32 0.5, %v628_v45  ;;  %vm646_vm12 = vcmp.ge.f32.partialorder %v638_v50, 1.0  ;;  %vm650_vm13 = vcmp.ge.f32.partialorder %v642_v58, 1.0 }
 0x13b   :  { %v641_v61 = vadd.f32 %v633_v48, %v617_v32  ;;  %v645_v40 = vadd.f32 %v637_v49, %v621_v33  ;;  %vm647_vm14 = vcmp.ge.f32.partialorder %v639_v52, 1.0  ;;  %vm651_vm15 = vcmp.ge.f32.partialorder %v643_v56, 1.0  ;;  %vm1764_vm4 = vmpackc.low %vm650_vm13, %vm646_vm12 }
 0x13c   :  { %v701_v62 = vsel %vm646_vm12, 0.0, %v638_v50  ;;  %v705_v46 = vsel %vm650_vm13, 0.0, %v642_v58  ;;  %v702_v51 = vsel %vm647_vm14, 0.0, %v639_v52  ;;  %v706_v63 = vsel %vm651_vm15, 0.0, %v643_v56  ;;  %vm1762_vm0 = vmpackc.low %vm651_vm15, %vm647_vm14 }
 0x13d   :  { %vm649_vm1 = vcmp.ge.f32.partialorder %v641_v61, 1.0  ;;  %vm653_vm2 = vcmp.ge.f32.partialorder %v645_v40, 1.0  ;;  %v710_v0 = vsub.f32 %v2367_v14, %v702_v51  ;;  %v714_v47 = vsub.f32 %v2369_v15, %v706_v63  ;;  %1763 = vmatprep.mubr.msk.bf16.mxu0 %vm1762_vm0, %v1993_v31 }
 0x13e   :  { %v704_v53 = vsel %vm649_vm1, 0.0, %v641_v61  ;;  %v708_v42 = vsel %vm653_vm2, 0.0, %v645_v40  ;;  %vm1778_vm3 = vmpackc.low %vm653_vm2, %vm649_vm1  ;;  %v709_v4 = vsub.f32 %v2349_v1, %v701_v62  ;;  %v713_v8 = vsub.f32 %v2351_v41, %v705_v46  ;;  %1765 = vmatmul.mubr.msk.bf16.gmra.mxu0 %vm1764_vm4, %v1993_v31 }
 0x13f   :  { %v712_v7 = vsub.f32 %v2371_v55, %v704_v53  ;;  %v716_v54 = vsub.f32 %v2373_v9, %v708_v42  ;;  %1779 = vmatprep.mubr.msk.bf16.mxu1 %vm1778_vm3, %v1993_v31  ;;  %v718_v10 = vmul.f32 0.5, %v710_v0  ;;  %v722_v11 = vmul.f32 0.5, %v714_v47 }
 0x140   :  { %v640_v12 = vadd.f32 %v632_v57, %v616_v25  ;;  %v644_v13 = vadd.f32 %v636_v59, %v620_v26  ;;  %v717_v17 = vmul.f32 0.5, %v709_v4  ;;  %v721_v18 = vmul.f32 0.5, %v713_v8 }
 0x141   :  { %v720_v43 = vmul.f32 0.5, %v712_v7  ;;  %v724_v16 = vmul.f32 0.5, %v716_v54  ;;  %v726_v19 = vadd.f32 %v718_v10, %v702_v51  ;;  %v730_v20 = vadd.f32 %v722_v11, %v706_v63 }
 0x142   :  { %vm648_vm5 = vcmp.ge.f32.partialorder %v640_v12, 1.0  ;;  %vm652_vm6 = vcmp.ge.f32.partialorder %v644_v13, 1.0  ;;  %v725_v36 = vadd.f32 %v717_v17, %v701_v62  ;;  %v729_v37 = vadd.f32 %v721_v18, %v705_v46 }
 0x143   :  { %v703_v21 = vsel %vm648_vm5, 0.0, %v640_v12  ;;  %v707_v22 = vsel %vm652_vm6, 0.0, %v644_v13  ;;  %vm1780_vm7 = vmpackc.low %vm652_vm6, %vm648_vm5  ;;  %v728_v23 = vadd.f32 %v720_v43, %v704_v53  ;;  %v732_v24 = vadd.f32 %v724_v16, %v708_v42 }
 0x144   :  { %v711_v27 = vsub.f32 %v2356_v2, %v703_v21  ;;  %v715_v28 = vsub.f32 %v2358_v3, %v707_v22  ;;  %1781 = vmatmul.mubr.msk.bf16.gmra.mxu1 %vm1780_vm7, %v1993_v31  ;;  %vm734_vm8 = vcmp.ge.f32.partialorder %v726_v19, 1.0  ;;  %vm738_vm9 = vcmp.ge.f32.partialorder %v730_v20, 1.0 }
 0x145   :  { %v789_v25 = vsel %vm734_vm8, 0.0, %v726_v19  ;;  %v793_v26 = vsel %vm738_vm9, 0.0, %v730_v20  ;;  %vm1766_vm10 = vmpackc.low %vm738_vm9, %vm734_vm8  ;;  %vm736_vm11 = vcmp.ge.f32.partialorder %v728_v23, 1.0  ;;  %vm740_vm12 = vcmp.ge.f32.partialorder %v732_v24, 1.0 }
 0x146   :  { %v719_v29 = vmul.f32 0.5, %v711_v27  ;;  %v723_v30 = vmul.f32 0.5, %v715_v28  ;;  %v797_v32 = vsub.f32 %v2367_v14, %v789_v25  ;;  %v801_v33 = vsub.f32 %v2369_v15, %v793_v26  ;;  %1767 = vmatprep.mubr.msk.bf16.mxu0 %vm1766_vm10, %v1993_v31  ;;  %vm1782_vm13 = vmpackc.low %vm740_vm12, %vm736_vm11 }
 0x147   :  { %v791_v34 = vsel %vm736_vm11, 0.0, %v728_v23  ;;  %v795_v35 = vsel %vm740_vm12, 0.0, %v732_v24  ;;  %1783 = vmatprep.mubr.msk.bf16.mxu1 %vm1782_vm13, %v1993_v31  ;;  %vm733_vm14 = vcmp.ge.f32.partialorder %v725_v36, 1.0  ;;  %vm737_vm15 = vcmp.ge.f32.partialorder %v729_v37, 1.0 }
 0x148   :  { %v799_v38 = vsub.f32 %v2371_v55, %v791_v34  ;;  %v803_v39 = vsub.f32 %v2373_v9, %v795_v35  ;;  %v727_v44 = vadd.f32 %v719_v29, %v703_v21  ;;  %v731_v45 = vadd.f32 %v723_v30, %v707_v22  ;;  %vm1768_vm0 = vmpackc.low %vm737_vm15, %vm733_vm14 }
 0x149   :  { %v805_v14 = vmul.f32 0.5, %v797_v32  ;;  %v809_v48 = vmul.f32 0.5, %v801_v33  ;;  %v788_v15 = vsel %vm733_vm14, 0.0, %v725_v36  ;;  %v792_v49 = vsel %vm737_vm15, 0.0, %v729_v37  ;;  %1769 = vmatmul.mubr.msk.bf16.gmra.mxu0 %vm1768_vm0, %v1993_v31 }
 0x14a   :  { %vm735_vm1 = vcmp.ge.f32.partialorder %v727_v44, 1.0  ;;  %vm739_vm2 = vcmp.ge.f32.partialorder %v731_v45, 1.0  ;;  %v796_v50 = vsub.f32 %v2349_v1, %v788_v15  ;;  %v800_v58 = vsub.f32 %v2351_v41, %v792_v49 }
 0x14b   :  { %v790_v55 = vsel %vm735_vm1, 0.0, %v727_v44  ;;  %v794_v52 = vsel %vm739_vm2, 0.0, %v731_v45  ;;  %vm1784_vm3 = vmpackc.low %vm739_vm2, %vm735_vm1  ;;  %v813_v57 = vadd.f32 %v805_v14, %v789_v25  ;;  %v817_v59 = vadd.f32 %v809_v48, %v793_v26 }
 0x14c   :  { %v798_v9 = vsub.f32 %v2356_v2, %v790_v55  ;;  %v802_v56 = vsub.f32 %v2358_v3, %v794_v52  ;;  %1785 = vmatmul.mubr.msk.bf16.gmra.mxu1 %vm1784_vm3, %v1993_v31  ;;  %v807_v61 = vmul.f32 0.5, %v799_v38  ;;  %v811_v40 = vmul.f32 0.5, %v803_v39 }
 0x14d   :  { %v804_v62 = vmul.f32 0.5, %v796_v50  ;;  %v808_v46 = vmul.f32 0.5, %v800_v58  ;;  %vm821_vm4 = vcmp.ge.f32.partialorder %v813_v57, 1.0  ;;  %vm825_vm5 = vcmp.ge.f32.partialorder %v817_v59, 1.0 }
 0x14e   :  { %v806_v1 = vmul.f32 0.5, %v798_v9  ;;  %v810_v41 = vmul.f32 0.5, %v802_v56  ;;  %vm1770_vm6 = vmpackc.low %vm825_vm5, %vm821_vm4  ;;  %v815_v51 = vadd.f32 %v807_v61, %v791_v34  ;;  %v819_v63 = vadd.f32 %v811_v40, %v795_v35 }
 0x14f   :  { %v812_v0 = vadd.f32 %v804_v62, %v788_v15  ;;  %v816_v47 = vadd.f32 %v808_v46, %v792_v49  ;;  %1771 = vmatprep.mubr.msk.bf16.mxu0 %vm1770_vm6, %v1993_v31 }
 0x150   :  { %v814_v2 = vadd.f32 %v806_v1, %v790_v55  ;;  %v818_v3 = vadd.f32 %v810_v41, %v794_v52  ;;  %vm823_vm7 = vcmp.ge.f32.partialorder %v815_v51, 1.0  ;;  %vm827_vm8 = vcmp.ge.f32.partialorder %v819_v63, 1.0 }
 0x151   :  { %vm820_vm9 = vcmp.ge.f32.partialorder %v812_v0, 1.0  ;;  %vm824_vm10 = vcmp.ge.f32.partialorder %v816_v47, 1.0  ;;  %vm1786_vm11 = vmpackc.low %vm827_vm8, %vm823_vm7 }
 0x152   :  { %vm822_vm12 = vcmp.ge.f32.partialorder %v814_v2, 1.0  ;;  %vm826_vm13 = vcmp.ge.f32.partialorder %v818_v3, 1.0  ;;  %1787 = vmatprep.mubr.msk.bf16.mxu1 %vm1786_vm11, %v1993_v31  ;;  %vm1772_vm14 = vmpackc.low %vm824_vm10, %vm820_vm9 }
 0x153   :  { %1773 = vmatmul.mubr.msk.bf16.gmra.mxu0 %vm1772_vm14, %v1993_v31  ;;  %vm1788_vm15 = vmpackc.low %vm826_vm13, %vm822_vm12 }
 0x154   :  { %1789 = vmatmul.mubr.msk.bf16.gmra.mxu1 %vm1788_vm15, %v1993_v31 }
 0x1f6   :  { %v1806_v53 = vpop.f32.mrf.mxu0 }
 0x1f8   :  { %v1846_v42 = vpop.f32.mrf.mxu1  ;;  %v1807_v7 = vpop.f32.mrf.mxu0 }
 0x1f9   :  { %v1808_v22 = vadd.f32 %v1807_v7, %v1806_v53 }
 0x1fa   :  { %v1847_v54 = vpop.f32.mrf.mxu1  ;;  %v1809_v4 = vpop.f32.mrf.mxu0 }
 0x1fb   :  { %v1848_v23 = vadd.f32 %v1847_v54, %v1846_v42 }
 0x1fc   :  { %v1849_v8 = vpop.f32.mrf.mxu1  ;;  %v1810_v10 = vpop.f32.mrf.mxu0 }
 0x1fd   :  { %v1811_v18 = vadd.f32 %v1810_v10, %v1809_v4  ;;  %v1327_v32 = vadd.f32 %v1848_v23, %v1808_v22 }
 0x1fe   :  { %v1850_v11 = vpop.f32.mrf.mxu1  ;;  %v1812_v12 = vpop.f32.mrf.mxu0 }
 0x1ff   :  { %v1851_v19 = vadd.f32 %v1850_v11, %v1849_v8  ;;  %v2441_v14 = vadd.f32 %v1327_v32, %v2172_v5 }
 0x200   :  { %v1813_v13 = vpop.f32.mrf.mxu0 }
 0x201   :  { %v1814_v31 = vadd.f32 %v1813_v13, %v1812_v12  ;;  %v1330_v28 = vadd.f32 %v1851_v19, %v1811_v18  ;;  %v1380_v57 = vmul.f32 %v2441_v14, %v2441_v14 }
 0x202   :  { %v1815_v16 = vpop.f32.mrf.mxu0 }
 0x203   :  { %v2438_v37 = vadd.f32 %v1330_v28, %v2174_v6 }
 0x204   :  { %v1852_v43 = vpop.f32.mrf.mxu1  ;;  %v1816_v20 = vpop.f32.mrf.mxu0 }
 0x205   :  { %v1817_v25 = vadd.f32 %v1816_v20, %v1815_v16  ;;  %v1381_v55 = vmul.f32 %v2438_v37, %v2438_v37  ;;  %v1367_v62 = vadd.f32 %v2438_v37, %v2441_v14 }
 0x206   :  { %v1853_v17 = vpop.f32.mrf.mxu1 }
 0x207   :  { %v1854_v24 = vadd.f32 %v1853_v17, %v1852_v43  ;;  %v1388_v41 = vadd.f32 %v1381_v55, %v1380_v57 }
 0x208   :  { %v1855_v21 = vpop.f32.mrf.mxu1 }
 0x209   :  { %v1818_v29 = vpop.f32.mrf.mxu0  ;;  %v1335_v33 = vadd.f32 %v1854_v24, %v1814_v31 }
 0x20a   :  { %v1856_v27 = vpop.f32.mrf.mxu1 }
 0x20b   :  { %v1857_v26 = vadd.f32 %v1856_v27, %v1855_v21  ;;  %v1819_v34 = vpop.f32.mrf.mxu0  ;;  %v2444_v48 = vadd.f32 %v1335_v33, %v2172_v5 }
 0x20c   :  { %v1858_v30 = vpop.f32.mrf.mxu1  ;;  %v1820_v35 = vadd.f32 %v1819_v34, %v1818_v29 }
 0x20d   :  { %v1338_v38 = vadd.f32 %v1857_v26, %v1817_v25  ;;  %v1821_v44 = vpop.f32.mrf.mxu0  ;;  %v1382_v59 = vmul.f32 %v2444_v48, %v2444_v48  ;;  %v1368_v47 = vadd.f32 %v1367_v62, %v2444_v48 }
 0x20e   :  { %v1859_v36 = vpop.f32.mrf.mxu1 }
 0x20f   :  { %v1860_v39 = vadd.f32 %v1859_v36, %v1858_v30  ;;  %v1822_v15 = vpop.f32.mrf.mxu0  ;;  %v2449_v52 = vadd.f32 %v1338_v38, %v2174_v6  ;;  %v1389_v42 = vadd.f32 %v1388_v41, %v1382_v59 }
 0x210   :  { %v1861_v45 = vpop.f32.mrf.mxu1  ;;  %v1823_v50 = vadd.f32 %v1822_v15, %v1821_v44 }
 0x211   :  { %v1343_v49 = vadd.f32 %v1860_v39, %v1820_v35  ;;  %v1383_v51 = vmul.f32 %v2449_v52, %v2449_v52  ;;  %v1369_v54 = vadd.f32 %v1368_v47, %v2449_v52 }
 0x212   :  { %v1862_v58 = vpop.f32.mrf.mxu1 }
 0x213   :  { %v1863_v9 = vadd.f32 %v1862_v58, %v1861_v45  ;;  %v1824_v56 = vpop.f32.mrf.mxu0  ;;  %v2458_v46 = vadd.f32 %v1343_v49, %v2172_v5  ;;  %v1390_v11 = vadd.f32 %v1389_v42, %v1383_v51 }
 0x214   :  { %v1864_v40 = vpop.f32.mrf.mxu1 }
 0x215   :  { %v1346_v61 = vadd.f32 %v1863_v9, %v1823_v50  ;;  %v1825_v1 = vpop.f32.mrf.mxu0  ;;  %v1384_v4 = vmul.f32 %v2458_v46, %v2458_v46  ;;  %v1370_v43 = vadd.f32 %v1369_v54, %v2458_v46  ;;  %v1365_v9 = vld [vmem:[%s2525_s7] sm:$0x1] }
 0x216   :  { %v1826_v63 = vadd.f32 %v1825_v1, %v1824_v56  ;;  %v1865_v0 = vpop.f32.mrf.mxu1 }
 0x217   :  { %v2464_v2 = vadd.f32 %v1346_v61, %v2174_v6  ;;  %v1866_v3 = vadd.f32 %v1865_v0, %v1864_v40  ;;  %v1827_v53 = vpop.f32.mrf.mxu0  ;;  %v1391_v19 = vadd.f32 %v1390_v11, %v1384_v4  ;;  %v1716_v40 = vld [vmem:[%s2526_s8] ss:$0 sm:$0xff] }
 0x218   :  { %v1867_v7 = vpop.f32.mrf.mxu1 }
 0x219   :  { %v1351_v8 = vadd.f32 %v1866_v3, %v1826_v63  ;;  %v1828_v10 = vpop.f32.mrf.mxu0  ;;  %v1385_v16 = vmul.f32 %v2464_v2, %v2464_v2  ;;  %v1371_v20 = vadd.f32 %v1370_v43, %v2464_v2 }
 0x21a   :  { %v1829_v12 = vadd.f32 %v1828_v10, %v1827_v53  ;;  %v1868_v13 = vpop.f32.mrf.mxu1 }
 0x21b   :  { %v2473_v17 = vadd.f32 %v1351_v8, %v2172_v5  ;;  %v1869_v18 = vadd.f32 %v1868_v13, %v1867_v7  ;;  %v1392_v23 = vadd.f32 %v1391_v19, %v1385_v16 }
 0x21d   :  { %v1386_v21 = vmul.f32 %v2473_v17, %v2473_v17  ;;  %v1354_v22 = vadd.f32 %v1869_v18, %v1829_v12  ;;  %v1372_v31 = vadd.f32 %v1371_v20, %v2473_v17 }
 0x21f   :  { %v2480_v24 = vadd.f32 %v1354_v22, %v2174_v6  ;;  %v1393_v27 = vadd.f32 %v1392_v23, %v1386_v21 }
 0x221   :  { %v1373_v28 = vadd.f32 %v1372_v31, %v2480_v24  ;;  %v1387_v5 = vmul.f32 %v2480_v24, %v2480_v24 }
 0x223   :  { %v1374_v25 = vrot.slane %v1373_v28, 4  ;;  %v1394_v26 = vadd.f32 %v1393_v27, %v1387_v5 }
 0x225   :  { %v1375_v29 = vadd.f32 %v1374_v25, %v1373_v28  ;;  %v1395_v30 = vrot.slane %v1394_v26, 4 }
 0x227   :  { %v1376_v32 = vrot.slane %v1375_v29, 2  ;;  %v1396_v33 = vadd.f32 %v1395_v30, %v1394_v26 }
 0x229   :  { %v1377_v34 = vadd.f32 %v1376_v32, %v1375_v29  ;;  %v1397_v35 = vrot.slane %v1396_v33, 2 }
 0x22b   :  { %v1378_v36 = vrot.slane %v1377_v34, 1  ;;  %v1398_v38 = vadd.f32 %v1397_v35, %v1396_v33 }
 0x22d   :  { %v1379_v39 = vadd.f32 %v1378_v36, %v1377_v34  ;;  %v1399_v44 = vrot.slane %v1398_v38, 1 }
 0x22f   :  { %v1400_v6 = vadd.f32 %v1399_v44, %v1398_v38  ;;  %v1401_v45 = vmul.f32 0.015625, %v1379_v39 }
 0x231   :  { %v1402_v15 = vmul.f32 0.015625, %v1400_v6  ;;  %v1403_v49 = vmul.f32 %v1401_v45, %v1401_v45  ;;  %v1407_v59 = vsub.f32 %v2438_v37, %v1401_v45  ;;  %v1406_v62 = vsub.f32 %v2441_v14, %v1401_v45 }
 0x232   :  { %v1409_v1 = vsub.f32 %v2449_v52, %v1401_v45  ;;  %v1408_v51 = vsub.f32 %v2444_v48, %v1401_v45  ;;  %v1411_v14 = vsub.f32 %v2464_v2, %v1401_v45  ;;  %v1410_v48 = vsub.f32 %v2458_v46, %v1401_v45 }
 0x233   :  { %v1404_v50 = vsub.f32 %v1402_v15, %v1403_v49  ;;  %v1413_v2 = vsub.f32 %v2480_v24, %v1401_v45  ;;  %v1412_v46 = vsub.f32 %v2473_v17, %v1401_v45  ;;  %v1994_v24 = vmov 0.0  }
 0x235   :  { %v1405_v58 = vmax.f32 %v1404_v50, 0.0 }
 0x237   :  { %v1414_v55 = vadd.f32 1e-05, %v1405_v58 }
 0x239   :  { %1966 = vrsqrt.f32 %v1414_v55 }
 0x246   :  { %v1967_v56 = vpop.eup %1966 }
 0x247   :  { %v1416_v57 = vmul.f32 %v1967_v56, %v1365_v9 }
 0x249   :  { %v1420_v61 = vrot.slane %v1416_v57, %v2166_v60 }
 0x24b   :  { %v1422_v41 = vmul.f32 %v1420_v61, %v1407_v59  ;;  %v1421_v63 = vmul.f32 %v1420_v61, %v1406_v62  ;;  %v1424_v0 = vmul.f32 %v1420_v61, %v1409_v1  ;;  %v1423_v3 = vmul.f32 %v1420_v61, %v1408_v51 }
 0x24c   :  { %v1426_v11 = vmul.f32 %v1420_v61, %v1411_v14  ;;  %v1425_v13 = vmul.f32 %v1420_v61, %v1410_v48  ;;  %v1428_v27 = vmul.f32 %v1420_v61, %v1413_v2  ;;  %v1427_v5 = vmul.f32 %v1420_v61, %v1412_v46  ;;  %v1725_v46 = vld [vmem:[%s2528_s10] ss:$0 sm:$0xff] }
 0x24d   :  { %v1436_v47 = vadd.f32 %v1716_v40, %v1422_v41  ;;  %v1435_v53 = vadd.f32 %v1716_v40, %v1421_v63  ;;  %v1438_v7 = vadd.f32 %v1716_v40, %v1424_v0  ;;  %v1437_v4 = vadd.f32 %v1716_v40, %v1423_v3 }
 0x24e   :  { %v1440_v19 = vadd.f32 %v1716_v40, %v1426_v11  ;;  %v1439_v21 = vadd.f32 %v1716_v40, %v1425_v13  ;;  %v1442_v30 = vadd.f32 %v1716_v40, %v1428_v27  ;;  %v1441_v33 = vadd.f32 %v1716_v40, %v1427_v5 }
 0x24f   :  { %v1454_v42 = vmul.f32 0.5, %v1436_v47  ;;  %v1453_v37 = vmul.f32 0.5, %v1435_v53 }
 0x251   :  { %vm1458_vm0 = vcmp.ge.f32.partialorder %v1454_v42, 1.0  ;;  %vm1457_vm1 = vcmp.ge.f32.partialorder %v1453_v37, 1.0 }
 0x252   :  { %v1466_v54 = vsel %vm1458_vm0, 0.0, %v1454_v42  ;;  %v1465_v52 = vsel %vm1457_vm1, 0.0, %v1453_v37  ;;  %v1718_v44 = vsel %vm1458_vm0, 1.0, %v1994_v24  ;;  %v1717_v50 = vsel %vm1457_vm1, 1.0, %v1994_v24 }
 0x253   :  { %v1471_v8 = vsub.f32 %v1438_v7, %v1466_v54  ;;  %v1470_v10 = vsub.f32 %v1437_v4, %v1465_v52 }
 0x255   :  { %v1473_v12 = vmul.f32 0.5, %v1471_v8  ;;  %v1472_v43 = vmul.f32 0.5, %v1470_v10 }
 0x257   :  { %v1475_v16 = vadd.f32 %v1473_v12, %v1466_v54  ;;  %v1474_v18 = vadd.f32 %v1472_v43, %v1465_v52 }
 0x259   :  { %vm1477_vm2 = vcmp.ge.f32.partialorder %v1475_v16, 1.0  ;;  %vm1476_vm3 = vcmp.ge.f32.partialorder %v1474_v18, 1.0 }
 0x25a   :  { %v1485_v20 = vsel %vm1477_vm2, 0.0, %v1475_v16  ;;  %v1484_v23 = vsel %vm1476_vm3, 0.0, %v1474_v18  ;;  %v1720_v36 = vsel %vm1477_vm2, 1.0, %v1994_v24  ;;  %v1719_v17 = vsel %vm1476_vm3, 1.0, %v1994_v24 }
 0x25b   :  { %v1490_v22 = vsub.f32 %v1440_v19, %v1485_v20  ;;  %v1489_v31 = vsub.f32 %v1439_v21, %v1484_v23  ;;  %v1483_v15 = vadd.f32 %v1720_v36, %v1718_v44  ;;  %v1482_v55 = vadd.f32 %v1719_v17, %v1717_v50  ;;  %v1524_v19 = vld [vmem:[%s2527_s9] sm:$0x1]  ;;  %s1970_s9 = scalar_lea.vmem %s1574_s13, 256 }
 0x25c   :  { %p1971_p0 = scmp.ne.s32.totalorder %s1574_s13, %s1970_s9  ;;  %p1976_p2 = scmp.lt.s32.totalorder %s1970_s9, %s1970_s9 }
 0x25d   :  { %v1492_v28 = vmul.f32 0.5, %v1490_v22  ;;  %v1491_v25 = vmul.f32 0.5, %v1489_v31 }
 0x25e   :  { %p1977_p3 = por %p1976_p2, %p1975_p1 }
 0x25f   :  { %v1494_v26 = vadd.f32 %v1492_v28, %v1485_v20  ;;  %v1493_v29 = vadd.f32 %v1491_v25, %v1484_v23 }
 0x260   :  { %p1978_p4 = pnand %p1977_p3, %p1971_p0 }
 0x261   :  { %vm1496_vm4 = vcmp.ge.f32.partialorder %v1494_v26, 1.0  ;;  %vm1495_vm5 = vcmp.ge.f32.partialorder %v1493_v29, 1.0 }
 0x262   :  { %v1504_v32 = vsel %vm1496_vm4, 0.0, %v1494_v26  ;;  %v1503_v35 = vsel %vm1495_vm5, 0.0, %v1493_v29  ;;  %v1722_v6 = vsel %vm1496_vm4, 1.0, %v1994_v24  ;;  %v1721_v58 = vsel %vm1495_vm5, 1.0, %v1994_v24 }
 0x263   :  { %v1509_v34 = vsub.f32 %v1442_v30, %v1504_v32  ;;  %v1508_v38 = vsub.f32 %v1441_v33, %v1503_v35  ;;  %v1502_v56 = vadd.f32 %v1722_v6, %v1483_v15  ;;  %v1501_v59 = vadd.f32 %v1721_v58, %v1482_v55 }
 0x265   :  { %v1511_v39 = vmul.f32 0.5, %v1509_v34  ;;  %v1510_v45 = vmul.f32 0.5, %v1508_v38 }
 0x267   :  { %v1513_v49 = vadd.f32 %v1511_v39, %v1504_v32  ;;  %v1512_v9 = vadd.f32 %v1510_v45, %v1503_v35 }
 0x269   :  { %vm1515_vm6 = vcmp.ge.f32.partialorder %v1513_v49, 1.0  ;;  %vm1514_vm7 = vcmp.ge.f32.partialorder %v1512_v9, 1.0 }
 0x26a   :  { %v1724_v57 = vsel %vm1515_vm6, 1.0, %v1994_v24  ;;  %v1723_v61 = vsel %vm1514_vm7, 1.0, %v1994_v24 }
 0x26b   :  { %v1521_v40 = vadd.f32 %v1724_v57, %v1502_v56  ;;  %v1520_v62 = vadd.f32 %v1723_v61, %v1501_v59 }
 0x26d   :  { %v1523_v1 = vmul.f32 0.25, %v1521_v40  ;;  %v1522_v41 = vmul.f32 0.25, %v1520_v62 }
 0x26f   :  { %v1534_v51 = vmul.f32 %v1523_v1, %v1523_v1  ;;  %v1526_v63 = vadd.f32 %v1523_v1, %v1522_v41  ;;  %v1533_v0 = vmul.f32 %v1522_v41, %v1522_v41 }
 0x271   :  { %v1527_v47 = vrot.slane %v1526_v63, 4  ;;  %v1535_v3 = vadd.f32 %v1534_v51, %v1533_v0 }
 0x273   :  { %v1528_v53 = vadd.f32 %v1527_v47, %v1526_v63  ;;  %v1536_v42 = vrot.slane %v1535_v3, 4 }
 0x275   :  { %v1529_v37 = vrot.slane %v1528_v53, 2  ;;  %v1537_v7 = vadd.f32 %v1536_v42, %v1535_v3 }
 0x277   :  { %v1530_v54 = vadd.f32 %v1529_v37, %v1528_v53  ;;  %v1538_v4 = vrot.slane %v1537_v7, 2 }
 0x279   :  { %v1531_v14 = vrot.slane %v1530_v54, 1  ;;  %v1539_v8 = vadd.f32 %v1538_v4, %v1537_v7 }
 0x27b   :  { %v1532_v52 = vadd.f32 %v1531_v14, %v1530_v54  ;;  %v1540_v48 = vrot.slane %v1539_v8, 1 }
 0x27d   :  { %v1541_v10 = vadd.f32 %v1540_v48, %v1539_v8  ;;  %v1542_v11 = vmul.f32 0.0625, %v1532_v52 }
 0x27f   :  { %v1543_v12 = vmul.f32 0.0625, %v1541_v10  ;;  %v1544_v13 = vmul.f32 %v1542_v11, %v1542_v11  ;;  %v1547_v2 = vsub.f32 %v1522_v41, %v1542_v11  ;;  %v1548_v22 = vsub.f32 %v1523_v1, %v1542_v11 }
 0x281   :  { %v1545_v43 = vsub.f32 %v1543_v12, %v1544_v13 }
 0x283   :  { %v1546_v16 = vmax.f32 %v1545_v43, 0.0 }
 0x285   :  { %v1549_v18 = vadd.f32 1e-05, %v1546_v16 }
 0x287   :  { %1968 = vrsqrt.f32 %v1549_v18 }
 0x294   :  { %v1969_v20 = vpop.eup %1968 }
 0x295   :  { %v1551_v21 = vmul.f32 %v1969_v20, %v1524_v19 }
 0x297   :  { %v1555_v23 = vrot.slane %v1551_v21, %v2166_v60 }
 0x299   :  { %v1556_v31 = vmul.f32 %v1555_v23, %v1547_v2  ;;  %v1557_v27 = vmul.f32 %v1555_v23, %v1548_v22 }
 0x29b   :  { %v1564_v28 = vadd.f32 %v1725_v46, %v1556_v31  ;;  %v1565_v5 = vadd.f32 %v1725_v46, %v1557_v27 }
 0x29d   :  { %1566 = vst [vmem:[#allocation4] sm:$0xff] %v1564_v28  ;;  %1567 = vst [vmem:[#allocation4 + $0x8] sm:$0xff] %v1565_v5 }
 0x29e   :  { %1981 = shalt.err (!%p1978_p4)
}
 0x29f   :  { %s1996_s2 = smov 128   ;;  %s1997_s14 = smov 8  }
 0x2a0   :  { %1579 = dma.vmem_to_hbm [thread:$0]  %s1574_s13, 256, %s2529_s11, [#allocation5], %s1996_s2, %s1996_s2, %s1997_s14  }
 0x2a1   :  { %1990 = dma.done.wait [#allocation5], 256  }
 0x2a2   :  { %1991 = vsyncadd [#allocation5], 4294967040 }
 0x2a3   :  { %1583 = vsyncpa [#allocation5], 1 }

</bundles_post_ra>
